<compile_context>
chip_gen: v7x
topology: tpu7x:2x2x1
jax: 0.10.0
libtpu: 0.0.40
codegen_flags: <defaults>
</compile_context>

<pallas_src>
import functools

import jax
import jax.numpy as jnp
from jax.experimental import pallas as pl
from jax.experimental.pallas import tpu as pltpu

EPS = 1e-5  # PyTorch GroupNorm default


# --------------------------------------------------------------------------- #
# Kernel
# --------------------------------------------------------------------------- #
def _attention_kernel(g_ref, x_ref, wg_ref, wx_ref, wp_ref, vec_ref, psc_ref,
                      out_ref, stat_ref, fold_ref, p_ref, *extra,
                      use_cache, compute_dtype):
    if use_cache:
        (cache_ref,) = extra
        wgs_ref = wxs_ref = None
    else:
        cache_ref = None
        wgs_ref, wxs_ref = extra

    ph = pl.program_id(1)   # 0: conv+stats, 1: GN-apply+relu+psi-proj, 2: gate
    t = pl.program_id(2)    # HW tile index

    f_int = wg_ref.shape[0]
    nt = p_ref.shape[0]
    tile = p_ref.shape[2]
    hw = nt * tile
    inv_n = 1.0 / float(f_int * hw)   # GN(1, F_int): mean over C*HW
    inv_hw = 1.0 / float(hw)          # GN(1, 1):     mean over HW

    # Per-channel params, channels on sublanes: columns of (F_int, 6).
    bg = vec_ref[:, 0:1]
    gamma_g = vec_ref[:, 1:2]
    beta_g = vec_ref[:, 2:3]
    bx = vec_ref[:, 3:4]
    gamma_x = vec_ref[:, 4:5]
    beta_x = vec_ref[:, 5:6]
    bp = psc_ref[0:1, 0:1]
    gnp_w = psc_ref[0:1, 1:2]
    gnp_b = psc_ref[0:1, 2:3]

    # fold_ref (F_int, 8) columns:
    #   0: cc   1: sg   2: sx   3: s_p   4: t_p   5: shift_g   6: shift_x   7: shift_p

    # ---------------- phase 0: 1x1 convs, shifted stats, optional cache ----------
    @pl.when(ph == 0)
    def _phase0():
        g_t = g_ref[0].astype(compute_dtype)          # (F_g, TILE)
        x_t = x_ref[0].astype(compute_dtype)          # (F_l, TILE)
        g1 = jnp.dot(wg_ref[...].astype(compute_dtype), g_t,
                     preferred_element_type=jnp.float32) + bg       # (F_int, TILE)
        x1 = jnp.dot(wx_ref[...].astype(compute_dtype), x_t,
                     preferred_element_type=jnp.float32) + bx

        @pl.when(t == 0)
        def _init():
            stat_ref[...] = jnp.zeros_like(stat_ref)
            # First-tile means as variance shifts (compensated single-pass stats).
            fold_ref[0:1, 5:6] = jnp.mean(g1, keepdims=True)
            fold_ref[0:1, 6:7] = jnp.mean(x1, keepdims=True)

        sh_g = fold_ref[0:1, 5:6]
        sh_x = fold_ref[0:1, 6:7]
        dg = g1 - sh_g
        dx = x1 - sh_x
        # Lane-partial accumulation: reduce over channels (sublanes) only; the
        # single cross-lane reduce happens once per sample at the phase boundary.
        stat_ref[0] += jnp.sum(dg, axis=0, keepdims=True)
        stat_ref[1] += jnp.sum(dg * dg, axis=0, keepdims=True)
        stat_ref[2] += jnp.sum(dx, axis=0, keepdims=True)
        stat_ref[3] += jnp.sum(dx * dx, axis=0, keepdims=True)

        if use_cache:
            cache_ref[0, t] = g1.astype(cache_ref.dtype)
            cache_ref[1, t] = x1.astype(cache_ref.dtype)

    # ---------------- phase 1: fused GN-apply + relu + psi projection ------------
    @pl.when(ph == 1)
    def _phase1():
        @pl.when(t == 0)
        def _fold():
            sum_dg = jnp.sum(stat_ref[0], keepdims=True)     # (1, 1)
            ssq_dg = jnp.sum(stat_ref[1], keepdims=True)
            sum_dx = jnp.sum(stat_ref[2], keepdims=True)
            ssq_dx = jnp.sum(stat_ref[3], keepdims=True)
            m_dg = sum_dg * inv_n
            m_dx = sum_dx * inv_n
            var_g = ssq_dg * inv_n - m_dg * m_dg
            var_x = ssq_dx * inv_n - m_dx * m_dx
            mu_g = fold_ref[0:1, 5:6] + m_dg
            mu_x = fold_ref[0:1, 6:7] + m_dx
            sg = gamma_g * jax.lax.rsqrt(var_g + EPS)         # (F_int, 1)
            sx = gamma_x * jax.lax.rsqrt(var_x + EPS)
            if use_cache:
                # Cached g1/x1 already contain the conv bias.
                cc = beta_g - mu_g * sg + beta_x - mu_x * sx
                fold_ref[:, 1:2] = sg
                fold_ref[:, 2:3] = sx
            else:
                # Fold GN scale into the conv weights once per sample.
                cc = (bg - mu_g) * sg + beta_g + (bx - mu_x) * sx + beta_x
                wgs_ref[...] = (wg_ref[...] * sg).astype(wgs_ref.dtype)
                wxs_ref[...] = (wx_ref[...] * sx).astype(wxs_ref.dtype)
            fold_ref[:, 0:1] = cc

        if use_cache:
            a = (fold_ref[:, 1:2] * cache_ref[0, t]
                 + fold_ref[:, 2:3] * cache_ref[1, t]
                 + fold_ref[:, 0:1])
        else:
            g_t = g_ref[0].astype(compute_dtype)
            x_t = x_ref[0].astype(compute_dtype)
            a = (jnp.dot(wgs_ref[...], g_t, preferred_element_type=jnp.float32)
                 + jnp.dot(wxs_ref[...], x_t, preferred_element_type=jnp.float32)
                 + fold_ref[:, 0:1])
        a = jnp.maximum(a, 0.0)                               # (F_int, TILE) f32

        # psi projection: VPU multiply + channel (sublane) reduction; an M=1 MXU
        # matmul would use 1/256 of the systolic array for no benefit.
        p = jnp.sum(a * wp_ref[...], axis=0, keepdims=True) + bp   # (1, TILE)

        @pl.when(t == 0)
        def _shift_p():
            fold_ref[0:1, 7:8] = jnp.mean(p, keepdims=True)

        dp = p - fold_ref[0:1, 7:8]
        stat_ref[4] += dp
        stat_ref[5] += dp * dp
        p_ref[t] = p                                          # stash for phase 2

    # ---------------- phase 2: psi = sigmoid(GN(p)), out = x * psi ----------------
    @pl.when(ph == 2)
    def _phase2():
        @pl.when(t == 0)
        def _fold_p():
            sum_dp = jnp.sum(stat_ref[4], keepdims=True)
            ssq_dp = jnp.sum(stat_ref[5], keepdims=True)
            m_dp = sum_dp * inv_hw
            var_p = ssq_dp * inv_hw - m_dp * m_dp
            mu_p = fold_ref[0:1, 7:8] + m_dp
            s_p = gnp_w * jax.lax.rsqrt(var_p + EPS)
            fold_ref[0:1, 3:4] = s_p
            fold_ref[0:1, 4:5] = gnp_b - mu_p * s_p

        psi = jax.nn.sigmoid(p_ref[t] * fold_ref[0:1, 3:4] + fold_ref[0:1, 4:5])
        out_ref[0] = (x_ref[0] * psi).astype(out_ref.dtype)   # broadcast over channels


# --------------------------------------------------------------------------- #
# Configuration helpers
# --------------------------------------------------------------------------- #
def _vmem_capacity_bytes():
    try:
        cap = int(pltpu.get_tpu_info().vmem_capacity_bytes)
        if cap > 0:
            return cap
    except Exception:
        pass
    return 64 << 20   # conservative: v7x per-TensorCore VMEM


def _pad(n, m):
    return -(-n // m) * m


def _vmem_usage(F_g, F_l, F_int, hw, tile, use_cache, io_bytes, c_bytes):
    nt = hw // tile
    fi = _pad(F_int, 8)
    # Grid-streamed blocks (double-buffered by the pipeline): g, x, out.
    use = 2 * io_bytes * tile * (_pad(F_g, 8) + 2 * _pad(F_l, 8))
    # Resident weight/param inputs (conservatively counted double-buffered, padded).
    use += 2 * 4 * (fi * _pad(F_g, 128) + fi * _pad(F_l, 128) + 2 * fi * 128 + 8 * 128)
    # Scratch: lane-partial stats (6,1,tile), fold coeffs, psi-logit cache (nt,1,tile).
    use += 6 * 8 * tile * 4 + fi * 128 * 4 + nt * 8 * tile * 4
    if use_cache:
        use += 2 * nt * fi * tile * c_bytes                     # g1/x1 cache
    else:
        use += c_bytes * (fi * _pad(F_g, 128) + fi * _pad(F_l, 128))  # folded weights
    return use


def _candidate_tiles(hw):
    # Block last dim must be a multiple of 128 or the full extent.
    # TODO(synk): non-128-multiple HW falls back to a single full-HW tile; a masked
    # tail tile would be more robust for very large unaligned feature maps.
    if hw % 128 != 0:
        return [hw]
    ts = {hw // k for k in range(1, hw // 128 + 1)
          if hw % k == 0 and (hw // k) % 128 == 0}
    return sorted(ts, reverse=True)


def _choose_tile(F_g, F_l, F_int, hw, budget, io_bytes, c_bytes):
    tiles = _candidate_tiles(hw)

    def fits(tile, cache):
        return _vmem_usage(F_g, F_l, F_int, hw, tile, cache, io_bytes, c_bytes) <= budget

    # 1) Whole sample resident (nt == 1): minimum HBM traffic (g, x each read once).
    if fits(hw, False):
        return hw
    # 2) Streaming: prefer a tile that also fits the g1/x1 cache (drops one HBM pass
    #    over g and one over x and halves the MXU work; for nt > 1 the traffic is
    #    otherwise independent of tile size).
    for t in tiles:
        if fits(t, True):
            return t
    for t in tiles:
        if fits(t, False):
            return t
    return tiles[-1]


# --------------------------------------------------------------------------- #
# Wrapper
# --------------------------------------------------------------------------- #
def attention_2dblock(g, x, params, *, tile_hw=None, use_cache=None,
                      compute_dtype=jnp.float32):
    """g: (B, F_g, H, W), x: (B, F_l, H, W) NCHW -> (B, F_l, H, W)."""
    B, F_g, H, W = g.shape
    Bx, F_l, Hx, Wx = x.shape
    assert (B, H, W) == (Bx, Hx, Wx)
    F_int = params["wg"].shape[0]
    hw = H * W

    io_bytes = jnp.dtype(x.dtype).itemsize
    c_bytes = jnp.dtype(compute_dtype).itemsize
    cap = _vmem_capacity_bytes()
    budget = (cap * 4) // 5   # ~80% of physical VMEM (generation-aware headroom)

    if tile_hw is None:
        tile_hw = _choose_tile(F_g, F_l, F_int, hw, budget, io_bytes, c_bytes)
    if use_cache is None:
        use_cache = _vmem_usage(F_g, F_l, F_int, hw, tile_hw, True,
                                io_bytes, c_bytes) <= budget
    assert hw % tile_hw == 0 and (tile_hw % 128 == 0 or tile_hw == hw)
    nt = hw // tile_hw

    # NCHW kept; only trailing spatial dims flattened (free reshape, no transpose).
    g_f = g.reshape(B, F_g, hw)
    x_f = x.reshape(B, F_l, hw)

    # Consolidated per-channel params, channels on sublanes:
    # columns are [bg, gng_w, gng_b, bx, gnx_w, gnx_b].
    vec = jnp.stack([params["bg"], params["gng_w"], params["gng_b"],
                     params["bx"], params["gnx_w"], params["gnx_b"]],
                    axis=1).astype(jnp.float32)                     # (F_int, 6)
    psc = jnp.reshape(jnp.stack([params["bp"], params["gnp_w"], params["gnp_b"]]),
                      (1, 3)).astype(jnp.float32)                   # (1, 3)
    wp_col = jnp.reshape(params["wp"], (F_int, 1)).astype(jnp.float32)  # (F_int, 1)

    def const_map(arr):
        return pl.BlockSpec(arr.shape, lambda b, ph, t: tuple(0 for _ in arr.shape))

    if use_cache:
        # g is only read in phase 0, x in phases 0 and 2; hold the last-fetched
        # block during unused phases so no extra DMAs are issued (index unchanged).
        g_spec = pl.BlockSpec((1, F_g, tile_hw),
                              lambda b, ph, t: (b, 0, jnp.where(ph == 0, t, nt - 1)))
        x_spec = pl.BlockSpec((1, F_l, tile_hw),
                              lambda b, ph, t: (b, 0, jnp.where(ph == 1, nt - 1, t)))
    else:
        g_spec = pl.BlockSpec((1, F_g, tile_hw),
                              lambda b, ph, t: (b, 0, jnp.where(ph == 2, nt - 1, t)))
        x_spec = pl.BlockSpec((1, F_l, tile_hw), lambda b, ph, t: (b, 0, t))
    out_spec = pl.BlockSpec(
        (1, F_l, tile_hw),
        # Output is written only in phase 2; during phases 0/1 keep the block index
        # constant so the (unwritten) buffer is never flushed over valid data.
        lambda b, ph, t: (b, 0, jnp.where(ph == 2, t, 0)))

    scratch = [
        pltpu.VMEM((6, 1, tile_hw), jnp.float32),      # lane-partial statistics
        pltpu.VMEM((F_int, 8), jnp.float32),           # folded GN coefficients
        pltpu.VMEM((nt, 1, tile_hw), jnp.float32),     # per-sample psi logits p
    ]
    if use_cache:
        scratch.append(pltpu.VMEM((2, nt, F_int, tile_hw), compute_dtype))  # g1/x1
    else:
        scratch.append(pltpu.VMEM((F_int, F_g), compute_dtype))   # Wg * sg
        scratch.append(pltpu.VMEM((F_int, F_l), compute_dtype))   # Wx * sx

    usage = _vmem_usage(F_g, F_l, F_int, hw, tile_hw, use_cache, io_bytes, c_bytes)
    vmem_limit = int(min(cap - (2 << 20), max(usage + (8 << 20), 32 << 20)))

    kernel = functools.partial(_attention_kernel, use_cache=use_cache,
                               compute_dtype=compute_dtype)

    out = pl.pallas_call(
        kernel,
        out_shape=jax.ShapeDtypeStruct((B, F_l, hw), x.dtype),
        grid_spec=pltpu.PrefetchScalarGridSpec(
            num_scalar_prefetch=0,
            grid=(B, 3, nt),
            in_specs=[
                g_spec,
                x_spec,
                const_map(params["wg"]),   # (F_int, F_g)
                const_map(params["wx"]),   # (F_int, F_l)
                const_map(wp_col),         # (F_int, 1)
                const_map(vec),            # (F_int, 6)
                const_map(psc),            # (1, 3)
            ],
            out_specs=out_spec,
            scratch_shapes=scratch,
        ),
        compiler_params=pltpu.CompilerParams(
            dimension_semantics=("parallel", "arbitrary", "arbitrary"),
            vmem_limit_bytes=vmem_limit,
        ),
    )(g_f, x_f, params["wg"], params["wx"], wp_col, vec, psc)

    return out.reshape(B, F_l, H, W)


# --------------------------------------------------------------------------- #
# Parameters & pure-JAX reference
# --------------------------------------------------------------------------- #
def init_params(key, F_g, F_l, F_int):
    ks = jax.random.split(key, 12)
    f32 = jnp.float32
    return {
        # 1x1 conv weights stored as (Cout, Cin); biases / GN affines as (C,) vectors.
        "wg": jax.random.normal(ks[0], (F_int, F_g), f32) * 0.2,
        "bg": jax.random.normal(ks[1], (F_int,), f32) * 0.1,
        "gng_w": 1.0 + 0.1 * jax.random.normal(ks[6], (F_int,), f32),
        "gng_b": 0.1 * jax.random.normal(ks[7], (F_int,), f32),
        "wx": jax.random.normal(ks[2], (F_int, F_l), f32) * 0.2,
        "bx": jax.random.normal(ks[3], (F_int,), f32) * 0.1,
        "gnx_w": 1.0 + 0.1 * jax.random.normal(ks[8], (F_int,), f32),
        "gnx_b": 0.1 * jax.random.normal(ks[9], (F_int,), f32),
        "wp": jax.random.normal(ks[4], (1, F_int), f32) * 0.2,
        "bp": jax.random.normal(ks[5], (), f32) * 0.1,
        "gnp_w": 1.0 + 0.1 * jax.random.normal(ks[10], (), f32),
        "gnp_b": 0.1 * jax.random.normal(ks[11], (), f32),
    }


def reference(g, x, params):
    # Pure-JAX NCHW reference of the PyTorch forward, for verification.
    def conv1x1(inp, w, b):  # w: (Cout, Cin)
        return jnp.einsum("bchw,dc->bdhw", inp, w) + jnp.reshape(b, (1, -1, 1, 1))

    def gn1(y, gamma, beta):  # GroupNorm(num_groups=1)
        mu = jnp.mean(y, axis=(1, 2, 3), keepdims=True)
        var = jnp.mean((y - mu) ** 2, axis=(1, 2, 3), keepdims=True)
        yn = (y - mu) / jnp.sqrt(var + EPS)
        return yn * jnp.reshape(gamma, (1, -1, 1, 1)) + jnp.reshape(beta, (1, -1, 1, 1))

    g1 = gn1(conv1x1(g, params["wg"], params["bg"]), params["gng_w"], params["gng_b"])
    x1 = gn1(conv1x1(x, params["wx"], params["bx"]), params["gnx_w"], params["gnx_b"])
    a = jnp.maximum(g1 + x1, 0.0)
    p = gn1(conv1x1(a, params["wp"], params["bp"]), params["gnp_w"], params["gnp_b"])
    return x * jax.nn.sigmoid(p)


if __name__ == "__main__":
    B, F_g, F_l, F_int, H, W = 2, 6, 4, 8, 16, 16
    key = jax.random.PRNGKey(0)
    kg, kx, kp = jax.random.split(key, 3)
    g = jax.random.normal(kg, (B, F_g, H, W), jnp.float32)
    x = jax.random.normal(kx, (B, F_l, H, W), jnp.float32)
    params = init_params(kp, F_g, F_l, F_int)

    ref = reference(g, x, params)

    def check(out, atol, rtol):
        assert out.shape == ref.shape
        ok = bool(jnp.allclose(out, ref, atol=atol, rtol=rtol))
        assert ok, float(jnp.max(jnp.abs(out - ref)))

    # Multi-tile streaming path (no g1/x1 cache): exercises folded-weight scratch.
    check(jax.block_until_ready(
        attention_2dblock(g, x, params, tile_hw=128, use_cache=False)), 2e-4, 2e-4)
    # Multi-tile path with the VMEM g1/x1 cache.
    check(jax.block_until_ready(
        attention_2dblock(g, x, params, tile_hw=128, use_cache=True)), 2e-4, 2e-4)
    # Auto configuration (single resident tile per sample, cache enabled).
    check(jax.block_until_ready(attention_2dblock(g, x, params)), 2e-4, 2e-4)
    # bf16 matmul operands (v6e/v7x fast path), looser tolerance.
    check(jax.block_until_ready(
        attention_2dblock(g, x, params, compute_dtype=jnp.bfloat16)), 5e-2, 5e-2)

    print("KERNEL_OK")
</pallas_src>

<mosaic_0001>
module attributes {stable_mosaic.version = 11 : i64} {
  func.func @_attention_kernel(%arg0: i32, %arg1: i32, %arg2: i32, %arg3: memref<1x6x128xf32, #tpu.memory_space<vmem>>, %arg4: memref<1x4x128xf32, #tpu.memory_space<vmem>>, %arg5: memref<8x6xf32, #tpu.memory_space<vmem>>, %arg6: memref<8x4xf32, #tpu.memory_space<vmem>>, %arg7: memref<8x1xf32, #tpu.memory_space<vmem>>, %arg8: memref<8x6xf32, #tpu.memory_space<vmem>>, %arg9: memref<1x3xf32, #tpu.memory_space<vmem>>, %arg10: memref<1x4x128xf32, #tpu.memory_space<vmem>>, %arg11: memref<6x1x128xf32, #tpu.memory_space<vmem>>, %arg12: memref<8x8xf32, #tpu.memory_space<vmem>>, %arg13: memref<2x1x128xf32, #tpu.memory_space<vmem>>, %arg14: memref<8x6xf32, #tpu.memory_space<vmem>>, %arg15: memref<8x4xf32, #tpu.memory_space<vmem>>) attributes {dimension_semantics = [#tpu.dimension_semantics<parallel>, #tpu.dimension_semantics<arbitrary>, #tpu.dimension_semantics<arbitrary>], iteration_bounds = array<i64: 2, 3, 2>, scalar_prefetch = 0 : i64, scratch_operands = 5 : i64, tpu.core_type = #tpu.core_type<tc>, window_params = [{transform_indices = @transform_0, window_bounds = array<i64: 1, 6, 128>}, {transform_indices = @transform_1, window_bounds = array<i64: 1, 4, 128>}, {pipeline_mode = #tpu.pipeline_mode<synchronous>, transform_indices = @transform_2, window_bounds = array<i64: 8, 6>}, {pipeline_mode = #tpu.pipeline_mode<synchronous>, transform_indices = @transform_3, window_bounds = array<i64: 8, 4>}, {pipeline_mode = #tpu.pipeline_mode<synchronous>, transform_indices = @transform_4, window_bounds = array<i64: 8, 1>}, {pipeline_mode = #tpu.pipeline_mode<synchronous>, transform_indices = @transform_5, window_bounds = array<i64: 8, 6>}, {pipeline_mode = #tpu.pipeline_mode<synchronous>, transform_indices = @transform_6, window_bounds = array<i64: 1, 3>}, {transform_indices = @transform_7, window_bounds = array<i64: 1, 4, 128>}]} {
    %c0 = arith.constant 0 : index
    %c0_0 = arith.constant 0 : index
    %0 = vector.load %arg8[%c0, %c0_0] : memref<8x6xf32, #tpu.memory_space<vmem>>, vector<8x1xf32>
    %c0_1 = arith.constant 0 : index
    %c1 = arith.constant 1 : index
    %1 = vector.load %arg8[%c0_1, %c1] : memref<8x6xf32, #tpu.memory_space<vmem>>, vector<8x1xf32>
    %c0_2 = arith.constant 0 : index
    %c2 = arith.constant 2 : index
    %2 = vector.load %arg8[%c0_2, %c2] : memref<8x6xf32, #tpu.memory_space<vmem>>, vector<8x1xf32>
    %c0_3 = arith.constant 0 : index
    %c3 = arith.constant 3 : index
    %3 = vector.load %arg8[%c0_3, %c3] : memref<8x6xf32, #tpu.memory_space<vmem>>, vector<8x1xf32>
    %c0_4 = arith.constant 0 : index
    %c4 = arith.constant 4 : index
    %4 = vector.load %arg8[%c0_4, %c4] : memref<8x6xf32, #tpu.memory_space<vmem>>, vector<8x1xf32>
    %c0_5 = arith.constant 0 : index
    %c5 = arith.constant 5 : index
    %5 = vector.load %arg8[%c0_5, %c5] : memref<8x6xf32, #tpu.memory_space<vmem>>, vector<8x1xf32>
    %c0_6 = arith.constant 0 : index
    %c0_7 = arith.constant 0 : index
    %6 = vector.load %arg9[%c0_6, %c0_7] : memref<1x3xf32, #tpu.memory_space<vmem>>, vector<1x1xf32>
    %c0_8 = arith.constant 0 : index
    %c1_9 = arith.constant 1 : index
    %7 = vector.load %arg9[%c0_8, %c1_9] : memref<1x3xf32, #tpu.memory_space<vmem>>, vector<1x1xf32>
    %c0_10 = arith.constant 0 : index
    %c2_11 = arith.constant 2 : index
    %8 = vector.load %arg9[%c0_10, %c2_11] : memref<1x3xf32, #tpu.memory_space<vmem>>, vector<1x1xf32>
    %c0_i32 = arith.constant 0 : i32
    %9 = arith.cmpi eq, %arg1, %c0_i32 : i32
    %10 = arith.extui %9 : i1 to i32
    %c0_i32_12 = arith.constant 0 : i32
    %11 = arith.cmpi ne, %10, %c0_i32_12 : i32
    scf.if %11 {
      %c0_15 = arith.constant 0 : index
      %c0_16 = arith.constant 0 : index
      %c0_17 = arith.constant 0 : index
      %18 = vector.load %arg3[%c0_15, %c0_16, %c0_17] : memref<1x6x128xf32, #tpu.memory_space<vmem>>, vector<1x6x128xf32>
      %19 = vector.shape_cast %18 : vector<1x6x128xf32> to vector<6x128xf32>
      %c0_18 = arith.constant 0 : index
      %c0_19 = arith.constant 0 : index
      %c0_20 = arith.constant 0 : index
      %20 = vector.load %arg4[%c0_18, %c0_19, %c0_20] : memref<1x4x128xf32, #tpu.memory_space<vmem>>, vector<1x4x128xf32>
      %21 = vector.shape_cast %20 : vector<1x4x128xf32> to vector<4x128xf32>
      %c0_21 = arith.constant 0 : index
      %c0_22 = arith.constant 0 : index
      %22 = vector.load %arg5[%c0_21, %c0_22] : memref<8x6xf32, #tpu.memory_space<vmem>>, vector<8x6xf32>
      %cst = arith.constant dense<0.000000e+00> : vector<8x128xf32>
      %23 = tpu.matmul %22, %19, %cst {dimension_numbers = #tpu.dot_dimension_numbers<[1], [0], [0], [1], [0, 0, 1, 1], [], []>} : vector<8x6xf32>, vector<6x128xf32>, vector<8x128xf32> -> vector<8x128xf32>
      %24 = vector.broadcast %0 : vector<8x1xf32> to vector<8x128xf32>
      %25 = arith.addf %23, %24 : vector<8x128xf32>
      %c0_23 = arith.constant 0 : index
      %c0_24 = arith.constant 0 : index
      %26 = vector.load %arg6[%c0_23, %c0_24] : memref<8x4xf32, #tpu.memory_space<vmem>>, vector<8x4xf32>
      %cst_25 = arith.constant dense<0.000000e+00> : vector<8x128xf32>
      %27 = tpu.matmul %26, %21, %cst_25 {dimension_numbers = #tpu.dot_dimension_numbers<[1], [0], [0], [1], [0, 0, 1, 1], [], []>} : vector<8x4xf32>, vector<4x128xf32>, vector<8x128xf32> -> vector<8x128xf32>
      %28 = vector.broadcast %3 : vector<8x1xf32> to vector<8x128xf32>
      %29 = arith.addf %27, %28 : vector<8x128xf32>
      %c0_i32_26 = arith.constant 0 : i32
      %30 = arith.cmpi eq, %arg2, %c0_i32_26 : i32
      %31 = arith.extui %30 : i1 to i32
      %c0_i32_27 = arith.constant 0 : i32
      %32 = arith.cmpi ne, %31, %c0_i32_27 : i32
      scf.if %32 {
        %cst_59 = arith.constant 0.000000e+00 : f32
        %73 = vector.broadcast %cst_59 : f32 to vector<6x1x128xf32>
        %c0_60 = arith.constant 0 : index
        %c0_61 = arith.constant 0 : index
        %c0_62 = arith.constant 0 : index
        %74 = vector.load %arg11[%c0_60, %c0_61, %c0_62] : memref<6x1x128xf32, #tpu.memory_space<vmem>>, vector<6x1x128xf32>
        tpu.vector_store %arg11[%c0_60, %c0_61, %c0_62], %73 {strides = array<i32>} : memref<6x1x128xf32, #tpu.memory_space<vmem>>, vector<6x1x128xf32>,
        %75 = vector.shape_cast %25 : vector<8x128xf32> to vector<1x8x128xf32>
        %cst_63 = arith.constant dense<0.000000e+00> : vector<1xf32>
        %76 = vector.multi_reduction <add>, %75, %cst_63 [1, 2] : vector<1x8x128xf32> to vector<1xf32>
        %77 = vector.shape_cast %76 : vector<1xf32> to vector<1x1x1xf32>
        %78 = vector.extract %77[0, 0, 0] : f32 from vector<1x1x1xf32>
        %79 = vector.broadcast %78 : f32 to vector<1x1xf32>
        %cst_64 = arith.constant 1.024000e+03 : f32
        %80 = vector.broadcast %cst_64 : f32 to vector<1x1xf32>
        %81 = arith.divf %79, %80 : vector<1x1xf32>
        %c0_65 = arith.constant 0 : index
        %c5_66 = arith.constant 5 : index
        %82 = vector.load %arg12[%c0_65, %c5_66] : memref<8x8xf32, #tpu.memory_space<vmem>>, vector<1x1xf32>
        tpu.vector_store %arg12[%c0_65, %c5_66], %81 {strides = array<i32>} : memref<8x8xf32, #tpu.memory_space<vmem>>, vector<1x1xf32>,
        %83 = vector.shape_cast %29 : vector<8x128xf32> to vector<1x8x128xf32>
        %cst_67 = arith.constant dense<0.000000e+00> : vector<1xf32>
        %84 = vector.multi_reduction <add>, %83, %cst_67 [1, 2] : vector<1x8x128xf32> to vector<1xf32>
        %85 = vector.shape_cast %84 : vector<1xf32> to vector<1x1x1xf32>
        %86 = vector.extract %85[0, 0, 0] : f32 from vector<1x1x1xf32>
        %87 = vector.broadcast %86 : f32 to vector<1x1xf32>
        %cst_68 = arith.constant 1.024000e+03 : f32
        %88 = vector.broadcast %cst_68 : f32 to vector<1x1xf32>
        %89 = arith.divf %87, %88 : vector<1x1xf32>
        %c0_69 = arith.constant 0 : index
        %c6_70 = arith.constant 6 : index
        %90 = vector.load %arg12[%c0_69, %c6_70] : memref<8x8xf32, #tpu.memory_space<vmem>>, vector<1x1xf32>
        tpu.vector_store %arg12[%c0_69, %c6_70], %89 {strides = array<i32>} : memref<8x8xf32, #tpu.memory_space<vmem>>, vector<1x1xf32>,
      } else {
      }
      %c0_28 = arith.constant 0 : index
      %c5_29 = arith.constant 5 : index
      %33 = vector.load %arg12[%c0_28, %c5_29] : memref<8x8xf32, #tpu.memory_space<vmem>>, vector<1x1xf32>
      %c0_30 = arith.constant 0 : index
      %c6 = arith.constant 6 : index
      %34 = vector.load %arg12[%c0_30, %c6] : memref<8x8xf32, #tpu.memory_space<vmem>>, vector<1x1xf32>
      %35 = vector.broadcast %33 : vector<1x1xf32> to vector<8x128xf32>
      %36 = arith.subf %25, %35 : vector<8x128xf32>
      %37 = vector.broadcast %34 : vector<1x1xf32> to vector<8x128xf32>
      %38 = arith.subf %29, %37 : vector<8x128xf32>
      %c0_31 = arith.constant 0 : index
      %c0_32 = arith.constant 0 : index
      %c0_33 = arith.constant 0 : index
      %39 = vector.load %arg11[%c0_31, %c0_32, %c0_33] : memref<6x1x128xf32, #tpu.memory_space<vmem>>, vector<1x1x128xf32>
      %40 = vector.shape_cast %39 : vector<1x1x128xf32> to vector<1x128xf32>
      %cst_34 = arith.constant dense<0.000000e+00> : vector<128xf32>
      %41 = vector.multi_reduction <add>, %36, %cst_34 [0] : vector<8x128xf32> to vector<128xf32>
      %42 = vector.shape_cast %41 : vector<128xf32> to vector<1x128xf32>
      %43 = arith.addf %40, %42 : vector<1x128xf32>
      %c0_35 = arith.constant 0 : index
      %c0_36 = arith.constant 0 : index
      %c0_37 = arith.constant 0 : index
      %44 = vector.load %arg11[%c0_35, %c0_36, %c0_37] : memref<6x1x128xf32, #tpu.memory_space<vmem>>, vector<1x1x128xf32>
      %45 = vector.shape_cast %44 : vector<1x1x128xf32> to vector<1x128xf32>
      %46 = vector.shape_cast %43 : vector<1x128xf32> to vector<1x1x128xf32>
      tpu.vector_store %arg11[%c0_35, %c0_36, %c0_37], %46 {strides = array<i32>} : memref<6x1x128xf32, #tpu.memory_space<vmem>>, vector<1x1x128xf32>,
      %c1_38 = arith.constant 1 : index
      %c0_39 = arith.constant 0 : index
      %c0_40 = arith.constant 0 : index
      %47 = vector.load %arg11[%c1_38, %c0_39, %c0_40] : memref<6x1x128xf32, #tpu.memory_space<vmem>>, vector<1x1x128xf32>
      %48 = vector.shape_cast %47 : vector<1x1x128xf32> to vector<1x128xf32>
      %49 = arith.mulf %36, %36 : vector<8x128xf32>
      %cst_41 = arith.constant dense<0.000000e+00> : vector<128xf32>
      %50 = vector.multi_reduction <add>, %49, %cst_41 [0] : vector<8x128xf32> to vector<128xf32>
      %51 = vector.shape_cast %50 : vector<128xf32> to vector<1x128xf32>
      %52 = arith.addf %48, %51 : vector<1x128xf32>
      %c1_42 = arith.constant 1 : index
      %c0_43 = arith.constant 0 : index
      %c0_44 = arith.constant 0 : index
      %53 = vector.load %arg11[%c1_42, %c0_43, %c0_44] : memref<6x1x128xf32, #tpu.memory_space<vmem>>, vector<1x1x128xf32>
      %54 = vector.shape_cast %53 : vector<1x1x128xf32> to vector<1x128xf32>
      %55 = vector.shape_cast %52 : vector<1x128xf32> to vector<1x1x128xf32>
      tpu.vector_store %arg11[%c1_42, %c0_43, %c0_44], %55 {strides = array<i32>} : memref<6x1x128xf32, #tpu.memory_space<vmem>>, vector<1x1x128xf32>,
      %c2_45 = arith.constant 2 : index
      %c0_46 = arith.constant 0 : index
      %c0_47 = arith.constant 0 : index
      %56 = vector.load %arg11[%c2_45, %c0_46, %c0_47] : memref<6x1x128xf32, #tpu.memory_space<vmem>>, vector<1x1x128xf32>
      %57 = vector.shape_cast %56 : vector<1x1x128xf32> to vector<1x128xf32>
      %cst_48 = arith.constant dense<0.000000e+00> : vector<128xf32>
      %58 = vector.multi_reduction <add>, %38, %cst_48 [0] : vector<8x128xf32> to vector<128xf32>
      %59 = vector.shape_cast %58 : vector<128xf32> to vector<1x128xf32>
      %60 = arith.addf %57, %59 : vector<1x128xf32>
      %c2_49 = arith.constant 2 : index
      %c0_50 = arith.constant 0 : index
      %c0_51 = arith.constant 0 : index
      %61 = vector.load %arg11[%c2_49, %c0_50, %c0_51] : memref<6x1x128xf32, #tpu.memory_space<vmem>>, vector<1x1x128xf32>
      %62 = vector.shape_cast %61 : vector<1x1x128xf32> to vector<1x128xf32>
      %63 = vector.shape_cast %60 : vector<1x128xf32> to vector<1x1x128xf32>
      tpu.vector_store %arg11[%c2_49, %c0_50, %c0_51], %63 {strides = array<i32>} : memref<6x1x128xf32, #tpu.memory_space<vmem>>, vector<1x1x128xf32>,
      %c3_52 = arith.constant 3 : index
      %c0_53 = arith.constant 0 : index
      %c0_54 = arith.constant 0 : index
      %64 = vector.load %arg11[%c3_52, %c0_53, %c0_54] : memref<6x1x128xf32, #tpu.memory_space<vmem>>, vector<1x1x128xf32>
      %65 = vector.shape_cast %64 : vector<1x1x128xf32> to vector<1x128xf32>
      %66 = arith.mulf %38, %38 : vector<8x128xf32>
      %cst_55 = arith.constant dense<0.000000e+00> : vector<128xf32>
      %67 = vector.multi_reduction <add>, %66, %cst_55 [0] : vector<8x128xf32> to vector<128xf32>
      %68 = vector.shape_cast %67 : vector<128xf32> to vector<1x128xf32>
      %69 = arith.addf %65, %68 : vector<1x128xf32>
      %c3_56 = arith.constant 3 : index
      %c0_57 = arith.constant 0 : index
      %c0_58 = arith.constant 0 : index
      %70 = vector.load %arg11[%c3_56, %c0_57, %c0_58] : memref<6x1x128xf32, #tpu.memory_space<vmem>>, vector<1x1x128xf32>
      %71 = vector.shape_cast %70 : vector<1x1x128xf32> to vector<1x128xf32>
      %72 = vector.shape_cast %69 : vector<1x128xf32> to vector<1x1x128xf32>
      tpu.vector_store %arg11[%c3_56, %c0_57, %c0_58], %72 {strides = array<i32>} : memref<6x1x128xf32, #tpu.memory_space<vmem>>, vector<1x1x128xf32>,
    } else {
    }
    %c1_i32 = arith.constant 1 : i32
    %12 = arith.cmpi eq, %arg1, %c1_i32 : i32
    %13 = arith.extui %12 : i1 to i32
    %c0_i32_13 = arith.constant 0 : i32
    %14 = arith.cmpi ne, %13, %c0_i32_13 : i32
    scf.if %14 {
      %c0_i32_15 = arith.constant 0 : i32
      %18 = arith.cmpi eq, %arg2, %c0_i32_15 : i32
      %19 = arith.extui %18 : i1 to i32
      %c0_i32_16 = arith.constant 0 : i32
      %20 = arith.cmpi ne, %19, %c0_i32_16 : i32
      scf.if %20 {
        %c0_51 = arith.constant 0 : index
        %c0_52 = arith.constant 0 : index
        %c0_53 = arith.constant 0 : index
        %65 = vector.load %arg11[%c0_51, %c0_52, %c0_53] : memref<6x1x128xf32, #tpu.memory_space<vmem>>, vector<1x1x128xf32>
        %66 = vector.shape_cast %65 : vector<1x1x128xf32> to vector<1x128xf32>
        %67 = vector.shape_cast %66 : vector<1x128xf32> to vector<1x1x128xf32>
        %cst_54 = arith.constant dense<0.000000e+00> : vector<1xf32>
        %68 = vector.multi_reduction <add>, %67, %cst_54 [1, 2] : vector<1x1x128xf32> to vector<1xf32>
        %69 = vector.shape_cast %68 : vector<1xf32> to vector<1x1x1xf32>
        %70 = vector.extract %69[0, 0, 0] : f32 from vector<1x1x1xf32>
        %71 = vector.broadcast %70 : f32 to vector<1x1xf32>
        %c1_55 = arith.constant 1 : index
        %c0_56 = arith.constant 0 : index
        %c0_57 = arith.constant 0 : index
        %72 = vector.load %arg11[%c1_55, %c0_56, %c0_57] : memref<6x1x128xf32, #tpu.memory_space<vmem>>, vector<1x1x128xf32>
        %73 = vector.shape_cast %72 : vector<1x1x128xf32> to vector<1x128xf32>
        %74 = vector.shape_cast %73 : vector<1x128xf32> to vector<1x1x128xf32>
        %cst_58 = arith.constant dense<0.000000e+00> : vector<1xf32>
        %75 = vector.multi_reduction <add>, %74, %cst_58 [1, 2] : vector<1x1x128xf32> to vector<1xf32>
        %76 = vector.shape_cast %75 : vector<1xf32> to vector<1x1x1xf32>
        %77 = vector.extract %76[0, 0, 0] : f32 from vector<1x1x1xf32>
        %78 = vector.broadcast %77 : f32 to vector<1x1xf32>
        %c2_59 = arith.constant 2 : index
        %c0_60 = arith.constant 0 : index
        %c0_61 = arith.constant 0 : index
        %79 = vector.load %arg11[%c2_59, %c0_60, %c0_61] : memref<6x1x128xf32, #tpu.memory_space<vmem>>, vector<1x1x128xf32>
        %80 = vector.shape_cast %79 : vector<1x1x128xf32> to vector<1x128xf32>
        %81 = vector.shape_cast %80 : vector<1x128xf32> to vector<1x1x128xf32>
        %cst_62 = arith.constant dense<0.000000e+00> : vector<1xf32>
        %82 = vector.multi_reduction <add>, %81, %cst_62 [1, 2] : vector<1x1x128xf32> to vector<1xf32>
        %83 = vector.shape_cast %82 : vector<1xf32> to vector<1x1x1xf32>
        %84 = vector.extract %83[0, 0, 0] : f32 from vector<1x1x1xf32>
        %85 = vector.broadcast %84 : f32 to vector<1x1xf32>
        %c3_63 = arith.constant 3 : index
        %c0_64 = arith.constant 0 : index
        %c0_65 = arith.constant 0 : index
        %86 = vector.load %arg11[%c3_63, %c0_64, %c0_65] : memref<6x1x128xf32, #tpu.memory_space<vmem>>, vector<1x1x128xf32>
        %87 = vector.shape_cast %86 : vector<1x1x128xf32> to vector<1x128xf32>
        %88 = vector.shape_cast %87 : vector<1x128xf32> to vector<1x1x128xf32>
        %cst_66 = arith.constant dense<0.000000e+00> : vector<1xf32>
        %89 = vector.multi_reduction <add>, %88, %cst_66 [1, 2] : vector<1x1x128xf32> to vector<1xf32>
        %90 = vector.shape_cast %89 : vector<1xf32> to vector<1x1x1xf32>
        %91 = vector.extract %90[0, 0, 0] : f32 from vector<1x1x1xf32>
        %92 = vector.broadcast %91 : f32 to vector<1x1xf32>
        %cst_67 = arith.constant 4.8828125E-4 : f32
        %93 = vector.broadcast %cst_67 : f32 to vector<1x1xf32>
        %94 = arith.mulf %71, %93 : vector<1x1xf32>
        %cst_68 = arith.constant 4.8828125E-4 : f32
        %95 = vector.broadcast %cst_68 : f32 to vector<1x1xf32>
        %96 = arith.mulf %85, %95 : vector<1x1xf32>
        %cst_69 = arith.constant 4.8828125E-4 : f32
        %97 = vector.broadcast %cst_69 : f32 to vector<1x1xf32>
        %98 = arith.mulf %78, %97 : vector<1x1xf32>
        %99 = arith.mulf %94, %94 : vector<1x1xf32>
        %100 = arith.subf %98, %99 : vector<1x1xf32>
        %cst_70 = arith.constant 4.8828125E-4 : f32
        %101 = vector.broadcast %cst_70 : f32 to vector<1x1xf32>
        %102 = arith.mulf %92, %101 : vector<1x1xf32>
        %103 = arith.mulf %96, %96 : vector<1x1xf32>
        %104 = arith.subf %102, %103 : vector<1x1xf32>
        %c0_71 = arith.constant 0 : index
        %c5_72 = arith.constant 5 : index
        %105 = vector.load %arg12[%c0_71, %c5_72] : memref<8x8xf32, #tpu.memory_space<vmem>>, vector<1x1xf32>
        %106 = arith.addf %105, %94 : vector<1x1xf32>
        %c0_73 = arith.constant 0 : index
        %c6 = arith.constant 6 : index
        %107 = vector.load %arg12[%c0_73, %c6] : memref<8x8xf32, #tpu.memory_space<vmem>>, vector<1x1xf32>
        %108 = arith.addf %107, %96 : vector<1x1xf32>
        %cst_74 = arith.constant 9.99999974E-6 : f32
        %109 = vector.broadcast %cst_74 : f32 to vector<1x1xf32>
        %110 = arith.addf %100, %109 : vector<1x1xf32>
        %111 = math.rsqrt %110 : vector<1x1xf32>
        %112 = vector.broadcast %111 : vector<1x1xf32> to vector<8x1xf32>
        %113 = arith.mulf %1, %112 : vector<8x1xf32>
        %cst_75 = arith.constant 9.99999974E-6 : f32
        %114 = vector.broadcast %cst_75 : f32 to vector<1x1xf32>
        %115 = arith.addf %104, %114 : vector<1x1xf32>
        %116 = math.rsqrt %115 : vector<1x1xf32>
        %117 = vector.broadcast %116 : vector<1x1xf32> to vector<8x1xf32>
        %118 = arith.mulf %4, %117 : vector<8x1xf32>
        %119 = vector.broadcast %106 : vector<1x1xf32> to vector<8x1xf32>
        %120 = arith.subf %0, %119 : vector<8x1xf32>
        %121 = arith.mulf %120, %113 : vector<8x1xf32>
        %122 = arith.addf %121, %2 : vector<8x1xf32>
        %123 = vector.broadcast %108 : vector<1x1xf32> to vector<8x1xf32>
        %124 = arith.subf %3, %123 : vector<8x1xf32>
        %125 = arith.mulf %124, %118 : vector<8x1xf32>
        %126 = arith.addf %122, %125 : vector<8x1xf32>
        %127 = arith.addf %126, %5 : vector<8x1xf32>
        %c0_76 = arith.constant 0 : index
        %c0_77 = arith.constant 0 : index
        %128 = vector.load %arg5[%c0_76, %c0_77] : memref<8x6xf32, #tpu.memory_space<vmem>>, vector<8x6xf32>
        %129 = vector.broadcast %113 : vector<8x1xf32> to vector<8x6xf32>
        %130 = arith.mulf %128, %129 : vector<8x6xf32>
        %c0_78 = arith.constant 0 : index
        %c0_79 = arith.constant 0 : index
        %131 = vector.load %arg14[%c0_78, %c0_79] : memref<8x6xf32, #tpu.memory_space<vmem>>, vector<8x6xf32>
        tpu.vector_store %arg14[%c0_78, %c0_79], %130 {strides = array<i32>} : memref<8x6xf32, #tpu.memory_space<vmem>>, vector<8x6xf32>,
        %c0_80 = arith.constant 0 : index
        %c0_81 = arith.constant 0 : index
        %132 = vector.load %arg6[%c0_80, %c0_81] : memref<8x4xf32, #tpu.memory_space<vmem>>, vector<8x4xf32>
        %133 = vector.broadcast %118 : vector<8x1xf32> to vector<8x4xf32>
        %134 = arith.mulf %132, %133 : vector<8x4xf32>
        %c0_82 = arith.constant 0 : index
        %c0_83 = arith.constant 0 : index
        %135 = vector.load %arg15[%c0_82, %c0_83] : memref<8x4xf32, #tpu.memory_space<vmem>>, vector<8x4xf32>
        tpu.vector_store %arg15[%c0_82, %c0_83], %134 {strides = array<i32>} : memref<8x4xf32, #tpu.memory_space<vmem>>, vector<8x4xf32>,
        %c0_84 = arith.constant 0 : index
        %c0_85 = arith.constant 0 : index
        %136 = vector.load %arg12[%c0_84, %c0_85] : memref<8x8xf32, #tpu.memory_space<vmem>>, vector<8x1xf32>
        tpu.vector_store %arg12[%c0_84, %c0_85], %127 {strides = array<i32>} : memref<8x8xf32, #tpu.memory_space<vmem>>, vector<8x1xf32>,
      } else {
      }
      %c0_17 = arith.constant 0 : index
      %c0_18 = arith.constant 0 : index
      %c0_19 = arith.constant 0 : index
      %21 = vector.load %arg3[%c0_17, %c0_18, %c0_19] : memref<1x6x128xf32, #tpu.memory_space<vmem>>, vector<1x6x128xf32>
      %22 = vector.shape_cast %21 : vector<1x6x128xf32> to vector<6x128xf32>
      %c0_20 = arith.constant 0 : index
      %c0_21 = arith.constant 0 : index
      %c0_22 = arith.constant 0 : index
      %23 = vector.load %arg4[%c0_20, %c0_21, %c0_22] : memref<1x4x128xf32, #tpu.memory_space<vmem>>, vector<1x4x128xf32>
      %24 = vector.shape_cast %23 : vector<1x4x128xf32> to vector<4x128xf32>
      %c0_23 = arith.constant 0 : index
      %c0_24 = arith.constant 0 : index
      %25 = vector.load %arg14[%c0_23, %c0_24] : memref<8x6xf32, #tpu.memory_space<vmem>>, vector<8x6xf32>
      %cst = arith.constant dense<0.000000e+00> : vector<8x128xf32>
      %26 = tpu.matmul %25, %22, %cst {dimension_numbers = #tpu.dot_dimension_numbers<[1], [0], [0], [1], [0, 0, 1, 1], [], []>} : vector<8x6xf32>, vector<6x128xf32>, vector<8x128xf32> -> vector<8x128xf32>
      %c0_25 = arith.constant 0 : index
      %c0_26 = arith.constant 0 : index
      %27 = vector.load %arg15[%c0_25, %c0_26] : memref<8x4xf32, #tpu.memory_space<vmem>>, vector<8x4xf32>
      %cst_27 = arith.constant dense<0.000000e+00> : vector<8x128xf32>
      %28 = tpu.matmul %27, %24, %cst_27 {dimension_numbers = #tpu.dot_dimension_numbers<[1], [0], [0], [1], [0, 0, 1, 1], [], []>} : vector<8x4xf32>, vector<4x128xf32>, vector<8x128xf32> -> vector<8x128xf32>
      %29 = arith.addf %26, %28 : vector<8x128xf32>
      %c0_28 = arith.constant 0 : index
      %c0_29 = arith.constant 0 : index
      %30 = vector.load %arg12[%c0_28, %c0_29] : memref<8x8xf32, #tpu.memory_space<vmem>>, vector<8x1xf32>
      %31 = vector.broadcast %30 : vector<8x1xf32> to vector<8x128xf32>
      %32 = arith.addf %29, %31 : vector<8x128xf32>
      %cst_30 = arith.constant 0.000000e+00 : f32
      %33 = vector.broadcast %cst_30 : f32 to vector<8x128xf32>
      %34 = arith.maximumf %32, %33 : vector<8x128xf32>
      %c0_31 = arith.constant 0 : index
      %c0_32 = arith.constant 0 : index
      %35 = vector.load %arg7[%c0_31, %c0_32] : memref<8x1xf32, #tpu.memory_space<vmem>>, vector<8x1xf32>
      %36 = vector.broadcast %35 : vector<8x1xf32> to vector<8x128xf32>
      %37 = arith.mulf %34, %36 : vector<8x128xf32>
      %cst_33 = arith.constant dense<0.000000e+00> : vector<128xf32>
      %38 = vector.multi_reduction <add>, %37, %cst_33 [0] : vector<8x128xf32> to vector<128xf32>
      %39 = vector.shape_cast %38 : vector<128xf32> to vector<1x128xf32>
      %40 = vector.broadcast %6 : vector<1x1xf32> to vector<1x128xf32>
      %41 = arith.addf %39, %40 : vector<1x128xf32>
      %c0_i32_34 = arith.constant 0 : i32
      %42 = arith.cmpi eq, %arg2, %c0_i32_34 : i32
      %43 = arith.extui %42 : i1 to i32
      %c0_i32_35 = arith.constant 0 : i32
      %44 = arith.cmpi ne, %43, %c0_i32_35 : i32
      scf.if %44 {
        %65 = vector.shape_cast %41 : vector<1x128xf32> to vector<1x1x128xf32>
        %cst_51 = arith.constant dense<0.000000e+00> : vector<1xf32>
        %66 = vector.multi_reduction <add>, %65, %cst_51 [1, 2] : vector<1x1x128xf32> to vector<1xf32>
        %67 = vector.shape_cast %66 : vector<1xf32> to vector<1x1x1xf32>
        %68 = vector.extract %67[0, 0, 0] : f32 from vector<1x1x1xf32>
        %69 = vector.broadcast %68 : f32 to vector<1x1xf32>
        %cst_52 = arith.constant 1.280000e+02 : f32
        %70 = vector.broadcast %cst_52 : f32 to vector<1x1xf32>
        %71 = arith.divf %69, %70 : vector<1x1xf32>
        %c0_53 = arith.constant 0 : index
        %c7_54 = arith.constant 7 : index
        %72 = vector.load %arg12[%c0_53, %c7_54] : memref<8x8xf32, #tpu.memory_space<vmem>>, vector<1x1xf32>
        tpu.vector_store %arg12[%c0_53, %c7_54], %71 {strides = array<i32>} : memref<8x8xf32, #tpu.memory_space<vmem>>, vector<1x1xf32>,
      } else {
      }
      %c0_36 = arith.constant 0 : index
      %c7 = arith.constant 7 : index
      %45 = vector.load %arg12[%c0_36, %c7] : memref<8x8xf32, #tpu.memory_space<vmem>>, vector<1x1xf32>
      %46 = vector.broadcast %45 : vector<1x1xf32> to vector<1x128xf32>
      %47 = arith.subf %41, %46 : vector<1x128xf32>
      %c4_37 = arith.constant 4 : index
      %c0_38 = arith.constant 0 : index
      %c0_39 = arith.constant 0 : index
      %48 = vector.load %arg11[%c4_37, %c0_38, %c0_39] : memref<6x1x128xf32, #tpu.memory_space<vmem>>, vector<1x1x128xf32>
      %49 = vector.shape_cast %48 : vector<1x1x128xf32> to vector<1x128xf32>
      %50 = arith.addf %49, %47 : vector<1x128xf32>
      %c4_40 = arith.constant 4 : index
      %c0_41 = arith.constant 0 : index
      %c0_42 = arith.constant 0 : index
      %51 = vector.load %arg11[%c4_40, %c0_41, %c0_42] : memref<6x1x128xf32, #tpu.memory_space<vmem>>, vector<1x1x128xf32>
      %52 = vector.shape_cast %51 : vector<1x1x128xf32> to vector<1x128xf32>
      %53 = vector.shape_cast %50 : vector<1x128xf32> to vector<1x1x128xf32>
      tpu.vector_store %arg11[%c4_40, %c0_41, %c0_42], %53 {strides = array<i32>} : memref<6x1x128xf32, #tpu.memory_space<vmem>>, vector<1x1x128xf32>,
      %c5_43 = arith.constant 5 : index
      %c0_44 = arith.constant 0 : index
      %c0_45 = arith.constant 0 : index
      %54 = vector.load %arg11[%c5_43, %c0_44, %c0_45] : memref<6x1x128xf32, #tpu.memory_space<vmem>>, vector<1x1x128xf32>
      %55 = vector.shape_cast %54 : vector<1x1x128xf32> to vector<1x128xf32>
      %56 = arith.mulf %47, %47 : vector<1x128xf32>
      %57 = arith.addf %55, %56 : vector<1x128xf32>
      %c5_46 = arith.constant 5 : index
      %c0_47 = arith.constant 0 : index
      %c0_48 = arith.constant 0 : index
      %58 = vector.load %arg11[%c5_46, %c0_47, %c0_48] : memref<6x1x128xf32, #tpu.memory_space<vmem>>, vector<1x1x128xf32>
      %59 = vector.shape_cast %58 : vector<1x1x128xf32> to vector<1x128xf32>
      %60 = vector.shape_cast %57 : vector<1x128xf32> to vector<1x1x128xf32>
      tpu.vector_store %arg11[%c5_46, %c0_47, %c0_48], %60 {strides = array<i32>} : memref<6x1x128xf32, #tpu.memory_space<vmem>>, vector<1x1x128xf32>,
      %61 = arith.index_cast %arg2 : i32 to index
      %c0_49 = arith.constant 0 : index
      %c0_50 = arith.constant 0 : index
      %62 = vector.load %arg13[%61, %c0_49, %c0_50] : memref<2x1x128xf32, #tpu.memory_space<vmem>>, vector<1x1x128xf32>
      %63 = vector.shape_cast %62 : vector<1x1x128xf32> to vector<1x128xf32>
      %64 = vector.shape_cast %41 : vector<1x128xf32> to vector<1x1x128xf32>
      tpu.vector_store %arg13[%61, %c0_49, %c0_50], %64 {strides = array<i32>} : memref<2x1x128xf32, #tpu.memory_space<vmem>>, vector<1x1x128xf32>,
    } else {
    }
    %c2_i32 = arith.constant 2 : i32
    %15 = arith.cmpi eq, %arg1, %c2_i32 : i32
    %16 = arith.extui %15 : i1 to i32
    %c0_i32_14 = arith.constant 0 : i32
    %17 = arith.cmpi ne, %16, %c0_i32_14 : i32
    scf.if %17 {
      %c0_i32_15 = arith.constant 0 : i32
      %18 = arith.cmpi eq, %arg2, %c0_i32_15 : i32
      %19 = arith.extui %18 : i1 to i32
      %c0_i32_16 = arith.constant 0 : i32
      %20 = arith.cmpi ne, %19, %c0_i32_16 : i32
      scf.if %20 {
        %c4_29 = arith.constant 4 : index
        %c0_30 = arith.constant 0 : index
        %c0_31 = arith.constant 0 : index
        %42 = vector.load %arg11[%c4_29, %c0_30, %c0_31] : memref<6x1x128xf32, #tpu.memory_space<vmem>>, vector<1x1x128xf32>
        %43 = vector.shape_cast %42 : vector<1x1x128xf32> to vector<1x128xf32>
        %44 = vector.shape_cast %43 : vector<1x128xf32> to vector<1x1x128xf32>
        %cst_32 = arith.constant dense<0.000000e+00> : vector<1xf32>
        %45 = vector.multi_reduction <add>, %44, %cst_32 [1, 2] : vector<1x1x128xf32> to vector<1xf32>
        %46 = vector.shape_cast %45 : vector<1xf32> to vector<1x1x1xf32>
        %47 = vector.extract %46[0, 0, 0] : f32 from vector<1x1x1xf32>
        %48 = vector.broadcast %47 : f32 to vector<1x1xf32>
        %c5_33 = arith.constant 5 : index
        %c0_34 = arith.constant 0 : index
        %c0_35 = arith.constant 0 : index
        %49 = vector.load %arg11[%c5_33, %c0_34, %c0_35] : memref<6x1x128xf32, #tpu.memory_space<vmem>>, vector<1x1x128xf32>
        %50 = vector.shape_cast %49 : vector<1x1x128xf32> to vector<1x128xf32>
        %51 = vector.shape_cast %50 : vector<1x128xf32> to vector<1x1x128xf32>
        %cst_36 = arith.constant dense<0.000000e+00> : vector<1xf32>
        %52 = vector.multi_reduction <add>, %51, %cst_36 [1, 2] : vector<1x1x128xf32> to vector<1xf32>
        %53 = vector.shape_cast %52 : vector<1xf32> to vector<1x1x1xf32>
        %54 = vector.extract %53[0, 0, 0] : f32 from vector<1x1x1xf32>
        %55 = vector.broadcast %54 : f32 to vector<1x1xf32>
        %cst_37 = arith.constant 3.906250e-03 : f32
        %56 = vector.broadcast %cst_37 : f32 to vector<1x1xf32>
        %57 = arith.mulf %48, %56 : vector<1x1xf32>
        %cst_38 = arith.constant 3.906250e-03 : f32
        %58 = vector.broadcast %cst_38 : f32 to vector<1x1xf32>
        %59 = arith.mulf %55, %58 : vector<1x1xf32>
        %60 = arith.mulf %57, %57 : vector<1x1xf32>
        %61 = arith.subf %59, %60 : vector<1x1xf32>
        %c0_39 = arith.constant 0 : index
        %c7 = arith.constant 7 : index
        %62 = vector.load %arg12[%c0_39, %c7] : memref<8x8xf32, #tpu.memory_space<vmem>>, vector<1x1xf32>
        %63 = arith.addf %62, %57 : vector<1x1xf32>
        %cst_40 = arith.constant 9.99999974E-6 : f32
        %64 = vector.broadcast %cst_40 : f32 to vector<1x1xf32>
        %65 = arith.addf %61, %64 : vector<1x1xf32>
        %66 = math.rsqrt %65 : vector<1x1xf32>
        %67 = arith.mulf %7, %66 : vector<1x1xf32>
        %c0_41 = arith.constant 0 : index
        %c3_42 = arith.constant 3 : index
        %68 = vector.load %arg12[%c0_41, %c3_42] : memref<8x8xf32, #tpu.memory_space<vmem>>, vector<1x1xf32>
        tpu.vector_store %arg12[%c0_41, %c3_42], %67 {strides = array<i32>} : memref<8x8xf32, #tpu.memory_space<vmem>>, vector<1x1xf32>,
        %69 = arith.mulf %63, %67 : vector<1x1xf32>
        %70 = arith.subf %8, %69 : vector<1x1xf32>
        %c0_43 = arith.constant 0 : index
        %c4_44 = arith.constant 4 : index
        %71 = vector.load %arg12[%c0_43, %c4_44] : memref<8x8xf32, #tpu.memory_space<vmem>>, vector<1x1xf32>
        tpu.vector_store %arg12[%c0_43, %c4_44], %70 {strides = array<i32>} : memref<8x8xf32, #tpu.memory_space<vmem>>, vector<1x1xf32>,
      } else {
      }
      %21 = arith.index_cast %arg2 : i32 to index
      %c0_17 = arith.constant 0 : index
      %c0_18 = arith.constant 0 : index
      %22 = vector.load %arg13[%21, %c0_17, %c0_18] : memref<2x1x128xf32, #tpu.memory_space<vmem>>, vector<1x1x128xf32>
      %23 = vector.shape_cast %22 : vector<1x1x128xf32> to vector<1x128xf32>
      %c0_19 = arith.constant 0 : index
      %c3_20 = arith.constant 3 : index
      %24 = vector.load %arg12[%c0_19, %c3_20] : memref<8x8xf32, #tpu.memory_space<vmem>>, vector<1x1xf32>
      %25 = vector.broadcast %24 : vector<1x1xf32> to vector<1x128xf32>
      %26 = arith.mulf %23, %25 : vector<1x128xf32>
      %c0_21 = arith.constant 0 : index
      %c4_22 = arith.constant 4 : index
      %27 = vector.load %arg12[%c0_21, %c4_22] : memref<8x8xf32, #tpu.memory_space<vmem>>, vector<1x1xf32>
      %28 = vector.broadcast %27 : vector<1x1xf32> to vector<1x128xf32>
      %29 = arith.addf %26, %28 : vector<1x128xf32>
      %30 = arith.negf %29 : vector<1x128xf32>
      %31 = math.exp %30 : vector<1x128xf32>
      %cst = arith.constant 1.000000e+00 : f32
      %32 = vector.broadcast %cst : f32 to vector<1x128xf32>
      %33 = arith.addf %32, %31 : vector<1x128xf32>
      %34 = arith.divf %32, %33 : vector<1x128xf32>
      %c0_23 = arith.constant 0 : index
      %c0_24 = arith.constant 0 : index
      %c0_25 = arith.constant 0 : index
      %35 = vector.load %arg4[%c0_23, %c0_24, %c0_25] : memref<1x4x128xf32, #tpu.memory_space<vmem>>, vector<1x4x128xf32>
      %36 = vector.shape_cast %35 : vector<1x4x128xf32> to vector<4x128xf32>
      %37 = vector.broadcast %34 : vector<1x128xf32> to vector<4x128xf32>
      %38 = arith.mulf %36, %37 : vector<4x128xf32>
      %c0_26 = arith.constant 0 : index
      %c0_27 = arith.constant 0 : index
      %c0_28 = arith.constant 0 : index
      %39 = vector.load %arg10[%c0_26, %c0_27, %c0_28] : memref<1x4x128xf32, #tpu.memory_space<vmem>>, vector<1x4x128xf32>
      %40 = vector.shape_cast %39 : vector<1x4x128xf32> to vector<4x128xf32>
      %41 = vector.shape_cast %38 : vector<4x128xf32> to vector<1x4x128xf32>
      tpu.vector_store %arg10[%c0_26, %c0_27, %c0_28], %41 {strides = array<i32>} : memref<1x4x128xf32, #tpu.memory_space<vmem>>, vector<1x4x128xf32>,
    } else {
    }
    return
  }
  func.func @transform_0(%arg0: i32, %arg1: i32, %arg2: i32) -> (i32, i32, i32) {
    %c2_i32 = arith.constant 2 : i32
    %0 = arith.cmpi eq, %arg1, %c2_i32 : i32
    %c1_i32 = arith.constant 1 : i32
    %1 = arith.select %0, %c1_i32, %arg2 : i32
    %c0_i32 = arith.constant 0 : i32
    %c0_i32_0 = arith.constant 0 : i32
    return %arg0, %c0_i32, %1 : i32, i32, i32
  }
  func.func @transform_1(%arg0: i32, %arg1: i32, %arg2: i32) -> (i32, i32, i32) {
    %c0_i32 = arith.constant 0 : i32
    %c0_i32_0 = arith.constant 0 : i32
    return %arg0, %c0_i32, %arg2 : i32, i32, i32
  }
  func.func @transform_2(%arg0: i32, %arg1: i32, %arg2: i32) -> (i32, i32) {
    %c0_i32 = arith.constant 0 : i32
    %c0_i32_0 = arith.constant 0 : i32
    %c0_i32_1 = arith.constant 0 : i32
    return %c0_i32, %c0_i32_0 : i32, i32
  }
  func.func @transform_3(%arg0: i32, %arg1: i32, %arg2: i32) -> (i32, i32) {
    %c0_i32 = arith.constant 0 : i32
    %c0_i32_0 = arith.constant 0 : i32
    %c0_i32_1 = arith.constant 0 : i32
    return %c0_i32, %c0_i32_0 : i32, i32
  }
  func.func @transform_4(%arg0: i32, %arg1: i32, %arg2: i32) -> (i32, i32) {
    %c0_i32 = arith.constant 0 : i32
    %c0_i32_0 = arith.constant 0 : i32
    %c0_i32_1 = arith.constant 0 : i32
    return %c0_i32, %c0_i32_0 : i32, i32
  }
  func.func @transform_5(%arg0: i32, %arg1: i32, %arg2: i32) -> (i32, i32) {
    %c0_i32 = arith.constant 0 : i32
    %c0_i32_0 = arith.constant 0 : i32
    %c0_i32_1 = arith.constant 0 : i32
    return %c0_i32, %c0_i32_0 : i32, i32
  }
  func.func @transform_6(%arg0: i32, %arg1: i32, %arg2: i32) -> (i32, i32) {
    %c0_i32 = arith.constant 0 : i32
    %c0_i32_0 = arith.constant 0 : i32
    %c0_i32_1 = arith.constant 0 : i32
    return %c0_i32, %c0_i32_0 : i32, i32
  }
  func.func @transform_7(%arg0: i32, %arg1: i32, %arg2: i32) -> (i32, i32, i32) {
    %c2_i32 = arith.constant 2 : i32
    %0 = arith.cmpi eq, %arg1, %c2_i32 : i32
    %c0_i32 = arith.constant 0 : i32
    %1 = arith.select %0, %arg2, %c0_i32 : i32
    %c0_i32_0 = arith.constant 0 : i32
    %c0_i32_1 = arith.constant 0 : i32
    return %arg0, %c0_i32_0, %1 : i32, i32, i32
  }
}

</mosaic_0001>

<bundles_post_ra>
// kernel: tpu_custom_call.1
= control target key start
LH: loop header
LB: loop body
LE: loop exit
PB: predicated region body
PF: predicated region fallthrough
CT: control target
= control target key end

     0   :  { %s1845_s0 = inlined_call_operand.vmem [shape: f32[2,6,256], index: 0, kind: input, shape index: {}]   ;;  %s1846_s1 = inlined_call_operand.vmem [shape: f32[2,4,256], index: 1, kind: input, shape index: {}]   ;;  %s1847_s2 = inlined_call_operand.vmem [shape: f32[8,6], index: 2, kind: input, shape index: {}]   ;;  %s1848_s3 = inlined_call_operand.vmem [shape: f32[8,4], index: 3, kind: input, shape index: {}]   ;;  %s1849_s4 = inlined_call_operand.vmem [shape: f32[8,1], index: 4, kind: input, shape index: {}]   ;;  %s1850_s5 = inlined_call_operand.vmem [shape: f32[8,6], index: 5, kind: input, shape index: {}]   ;;  %s1851_s6 = inlined_call_operand.vmem [shape: f32[1,3], index: 6, kind: input, shape index: {}]   ;;  %s1852_s7 = inlined_call_operand.hbm [shape: f32[2,4,256], index: 7, kind: output, shape index: {}]  }
   0x1   :  { %1860 = sst [smem:[#allocation17_spill]] %s1850_s5 }
   0x2   :  { %1861 = sst [smem:[#allocation18_spill]] %s1851_s6 }
   0x3   :  { %12 = vsyncpa [#allocation8], 0 }
   0x4   :  { %14 = vsyncpa [#allocation8 + $0x1], 0  ;;  %s1616_s24 = smov 0   ;;  %s1618_s25 = smov 0  }
   0x5   :  { %s1620_s26 = smov 0   ;;  %s1622_s27 = smov 0  }
   0x6   :  { %s1624_s28 = smov 0   ;;  %s1626_s29 = smov 0  }
   0x7   :  { %s1628_s30 = smov 0   ;;  %s1630_s8 = smov 0  }
   0x8   :  { %s1632_s9 = smov 0   ;;  %s1634_s10 = smov 0  }
   0x9 LB: > { %1862 = sst [smem:[#allocation10_spill]] %s1538_s30  ;;  %s1230_s11 = sadd.s32 4294967295, %s1550_s10   ;;  %s1550_s10 = sphi %s1634_s10, %s20_s10   ;;  %s1546_s9 = sphi %s1632_s9, %s1880_s9   ;;  %s1542_s8 = sphi %s1630_s8, %s1879_s8   ;;  %s1538_s30 = sphi %s1628_s30, %s1884_s30   ;;  %s1534_s29 = sphi %s1626_s29, %s1877_s29   ;;  %s1530_s28 = sphi %s1624_s28, %s1876_s28   ;;  %s1526_s27 = sphi %s1622_s27, %s1875_s27   ;;  %s1522_s26 = sphi %s1620_s26, %s1883_s26   ;;  %s1518_s25 = sphi %s1618_s25, %s1882_s25   ;;  %s1514_s24 = sphi %s1616_s24, %s1881_s24  }
   0xa   : > { %1863 = sst [smem:[#allocation11_spill]] %s1542_s8  ;;  %s1231_s12 = sadd.s32 4294967294, %s1550_s10  }
   0xb   : > { %1864 = sst [smem:[#allocation12_spill]] %s1546_s9  ;;  %s32_s13 = sadd.s32 1, %s1538_s30 }
   0xc   : > { %s35_s14 = sadd.s32 1, %s1542_s8  ;;  %p33_p0 = scmp.ge.s32.totalorder %s32_s13, 2 }
   0xd   : > { %s39_s15 = sadd.s32 1, %s1546_s9  ;;  %p208_p1 = scmp.eq.s32.totalorder %s1542_s8, 2 }
   0xe   : > { %s217_s16 = sadd.s32 1, %s1522_s26  ;;  %s1886_s13 = smov (%p33_p0, %s32_s13), 0 }
   0xf   : > { %1865 = sst [smem:[#allocation13_spill]] %s1886_s13  ;;  %s1888_s14 = smov (!%p33_p0, %s35_s14), %s1542_s8 }
  0x10   : > { %s209_s17 = scalar_select %p208_p1, %s1538_s30, 0 }
  0x11   : > { %p37_p2 = scmp.ge.s32.totalorder %s1888_s14, 3  ;;  %p227_p3 = scmp.ne.s32.totalorder %s1522_s26, %s1518_s25 }
  0x12   : > { %p228_p4 = scmp.eq.s32.totalorder %s1230_s11, 11  ;;  %p233_p5 = scmp.ne.s32.totalorder %s1518_s25, %s1514_s24 }
  0x13   : > { %s1890_s14 = smov (%p37_p2, %s1888_s14), 0  ;;  %s1892_s15 = smov (!%p37_p2, %s39_s15), %s1546_s9 }
  0x14   : > { %1866 = sst [smem:[#allocation14_spill]] %s1890_s14  ;;  %p210_p6 = scmp.eq.s32.totalorder %s1890_s14, 2 }
  0x15   : > { %p1685_p7 = por %p228_p4, %p227_p3  ;;  %p41_p8 = scmp.ge.s32.totalorder %s1892_s15, 2 }
  0x16   : > { %p234_p9 = scmp.eq.s32.totalorder %s1231_s12, 11  ;;  %p1234_p11 = scmp.ge.s32.totalorder %s1550_s10, 1 }
  0x17   : > { %s211_s19 = scalar_select %p210_p6, %s1886_s13, 0 }
  0x18   : > { %s1894_s15 = smov (%p41_p8, %s1892_s15), 0  ;;  %p1692_p10 = por %p234_p9, %p233_p5 }
  0x19   : > { %1868 = sst [smem:[#allocation15_spill]] %s1894_s15  ;;  %s213_s20 = ssub.s32 %s209_s17, %s211_s19 }
  0x1a   : > { %s212_s22 = ssub.s32 %s1546_s9, %s1894_s15  ;;  %p293_p12 = scmp.lt.s32.totalorder %s1550_s10, 13 }
  0x1b   : > { %s214_s23 = sor.u32 %s213_s20, %s212_s22 }
  0x1c   : > { %p215_p13 = scmp.eq.s32.totalorder %s214_s23, 0  ;;  %p294_p0 = pnand %p1234_p11, %p293_p12 }
  0x1d   : > { %s1857_s12 = sand.u32 (!%p294_p0), 1, %s1518_s25   ;;  %p338_p1 = scmp.eq.s32.totalorder (!%p294_p0), %s1530_s28, 2 }
  0x1e   : > { %s1701_s11 = scalar_select %p215_p13, %s1522_s26, %s217_s16  }
  0x1f   : > { %297 = sbr.rel (%p294_p0) target bundleno = 2535 (0x9e7), region = 48  ;;  %s1871_s5 = sld [smem:[#allocation17_spill]] (!%p294_p0) }
  0x20   : > { %1870 = sst [smem:[#allocation16_spill]] %s1701_s11  ;;  %s1872_s6 = sld [smem:[#allocation18_spill]] (!%p294_p0) }
  0x21   : > { %s1717_s22 = sshll.u32 (!%p294_p0), %s1857_s12, 2  ;;  %p340_p2 = scmp.lt.s32.totalorder (!%p294_p0), %s1534_s29, 1 }
  0x22   : > { %p352_p3 = scmp.lt.s32.totalorder (!%p294_p0), %s1526_s27, 1  ;;  %s337_s11 = scalar_lea.vmem (!%p294_p0), [#allocation7], %s1717_s22 }
  0x23   : > { %p1240_p5 = scmp.ne.s32.totalorder (!%p294_p0), %s1530_s28, 0 }
  0x25   : > { %v1708_v0 = vld [vmem:[%s1871_s5] sm:$0xff] (!%p294_p0) }
  0x26   : > { %v1713_v1 = vld [vmem:[%s1872_s6] sm:$0x1]  ;;  %s339_s23 = scalar_select %p338_p1, 1, %s1526_s27 }
  0x27   : > { %s341_s15 = scalar_select %p340_p2, %s1534_s29, 1 }
  0x28   : > { %p342_p4 = scmp.lt.s32.totalorder %s339_s23, 1  ;;  %vm378_vm0 = vcmask (!%p1240_p5), 1045504   ;;  %vm461_vm1 = vcmask (!%p1240_p5), 1043456   ;;  %v1552_v3 = vmov (!%p1240_p5), 0.0   ;;  %v368_v5 = vld [vmem:[%s1847_s2] sm:$0xff] (!%p1240_p5)  ;;  %vm374_vm2 = vcmask (!%p1240_p5), 48128  }
  0x29   : > { %s1236_s14 = sshll.u32 %s341_s15, 1  ;;  %365 = sbr.rel (%p1240_p5) target bundleno = 671 (0x29f), region = 52  ;;  %1269 = vmatprep.subr.mxu0 (!%p1240_p5), %v1552_v3  ;;  %1274 = vmatprep.subr.mxu1 (!%p1240_p5), %v1552_v3  ;;  %v452_v6 = vld [vmem:[%s1848_s3] sm:$0xff] (!%p1240_p5)  ;;  %vm457_vm3 = vcmask (!%p1240_p5), 31744   ;;  %vm1553_vm4 = vmmov (!%p1240_p5), 0   ;;  %v1554_v7 = vmov (!%p1240_p5), 0  }
  0x2a   : > { %s1896_s23 = smov (!%p342_p4, %s339_s23), 1  ;;  %1271 = vmatprep.mubr.msk.f32.mxu0 (!%p1240_p5), %vm1553_vm4, %v1552_v3  ;;  %1276 = vmatprep.mubr.msk.f32.mxu1 (!%p1240_p5), %vm1553_vm4, %v1552_v3  ;;  %v1555_v8 = vmov (!%p1240_p5), 3   ;;  %p1245_p6 = scmp.ne.s32.totalorder (!%p1240_p5), %s1526_s27, 0 }
  0x2b   : > { %s353_s17 = scalar_select %p352_p3, %s1526_s27, 1 }
  0x2c   : > { %s345_s19 = sadd.s32 %s1236_s14, %s1896_s23  ;;  %1421 = vset.pattern.permute.xlu0 (!%p1240_p5), %v1554_v7 }
  0x2d   : > { %s1237_s5 = sshll.u32 %s345_s19, 3  ;;  %s355_s13 = sadd.s32 %s1236_s14, %s353_s17  ;;  %371 = vperm.xlu0 (!%p1240_p5), %1421, %v1708_v0  }
  0x2e   : > { %s1729_s16 = scalar_lea.vmem %s1845_s0, %s1237_s5  ;;  %s1239_s12 = sshll.u32 %s355_s13, 2 }
  0x2f   : > { %s1734_s30 = scalar_lea.vmem %s1846_s1, %s1239_s12  ;;  %v366_v2 = vld [vmem:[%s1729_s16] sm:$0x3f] (!%p1240_p5) }
  0x30   : > { %v367_v4 = vld [vmem:[%s1734_s30] sm:$0xf]  ;;  %1270 = vmatpush3.msk.msra.mxu0 %vm378_vm0, %v366_v2  ;;  %v1556_v17 = vmov (!%p1245_p6), 0.0   ;;  %vm557_vm5 = vcmask (!%p1245_p6), 41000   ;;  %vm570_vm6 = vcmask (!%p1245_p6), 49200  }
  0x31   : > { %1275 = vmatpush3.msk.msra.mxu1 %vm461_vm1, %v367_v4  ;;  %1272 = vmatmul.mubr.msk.f32.vlgmr.msra.gmra.mrb[0].mxu0 %vm374_vm2, %v368_v5  ;;  %539 = vst [vmem:[#allocation2] sm:$0x1] (!%p1245_p6), %v1556_v17  ;;  %540 = vst [vmem:[#allocation2 + $0x1] sm:$0x1] (!%p1245_p6), %v1556_v17 }
  0x32   : > { %1277 = vmatmul.mubr.msk.f32.vlgmr.msra.gmra.mrb[0].mxu1 %vm457_vm3, %v452_v6  ;;  %1422 = vset.pattern.permute.xlu0 %v1555_v8  ;;  %541 = vst [vmem:[#allocation2 + $0x2] sm:$0x1] (!%p1245_p6), %v1556_v17  ;;  %542 = vst [vmem:[#allocation2 + $0x3] sm:$0x1] (!%p1245_p6), %v1556_v17 }
  0x33   : > { %454 = vperm.xlu0 %1422, %v1708_v0   ;;  %543 = vst [vmem:[#allocation2 + $0x4] sm:$0x1] (!%p1245_p6), %v1556_v17  ;;  %544 = vst [vmem:[#allocation2 + $0x5] sm:$0x1] (!%p1245_p6), %v1556_v17 }
  0xac   : > { %v372_v9 = vpop.permute.xlu0 %371 }
  0xb2   : > { %v455_v10 = vpop.permute.xlu0 %454 }
 0x100   : > { %538 = sbr.rel (%p1245_p6) target bundleno = 475 (0x1db), region = 56 }
 0x104   : > { %v448_v11 = vpop.f32.mrb[0].mxu0 }
 0x105   : > { %v531_v12 = vpop.f32.mrb[0].mxu1  ;;  %v449_v13 = vadd.f32 %v448_v11, %v372_v9  ;;  %v1273_v15 = vpop.f32.mrb[1].mxu0 }
 0x106   : > { %v532_v14 = vadd.f32 %v531_v12, %v455_v10  ;;  %v1278_v16 = vpop.f32.mrb[1].mxu1 }
 0x107   : > { %545 = vadd.xlane.f32.xlu0 %v449_v13 }
 0x10b   : > { %559 = vadd.xlane.f32.xlu0 %v532_v14 }
 0x194   : > { %v546_v18 = vpop.xlane.xlu0 %545 }
 0x195   : > { %v547_v19 = vrot.slane %v546_v18, 4 }
 0x197   : > { %v548_v20 = vadd.f32 %v547_v19, %v546_v18 }
 0x198   : > { %v560_v21 = vpop.xlane.xlu0 %559 }
 0x199   : > { %v549_v22 = vrot.slane %v548_v20, 2  ;;  %v561_v23 = vrot.slane %v560_v21, 4 }
 0x19b   : > { %v562_v24 = vadd.f32 %v561_v23, %v560_v21  ;;  %v550_v25 = vadd.f32 %v549_v22, %v548_v20 }
 0x19d   : > { %v563_v26 = vrot.slane %v562_v24, 2  ;;  %v551_v27 = vrot.slane %v550_v25, 1 }
 0x19f   : > { %v564_v28 = vadd.f32 %v563_v26, %v562_v24  ;;  %v552_v29 = vadd.f32 %v551_v27, %v550_v25 }
 0x1a1   : > { %1289 = vpush %v552_v29  ;;  %v565_v30 = vrot.slane %v564_v28, 1 }
 0x1a3   : > { %v566_v31 = vadd.f32 %v565_v30, %v564_v28 }
 0x1a5   : > { %1291 = vpush %v566_v31 }
 0x1d2   : > { %s1290_s13 = spop %1289 }
 0x1d3   : > { %v554_v32 = vstv %s1290_s13 }
 0x1d4   : > { %v556_v33 = vmul.f32 0.0009765625, %v554_v32 }
 0x1d6   : > { %558 = vst.msk [vmem:[#allocation3] sm:$0x1] %vm557_vm5, %v556_v33  ;;  %s1292_s14 = spop %1291 }
 0x1d7   : > { %v568_v34 = vstv %s1292_s14 }
 0x1d8   : > { %v569_v35 = vmul.f32 0.0009765625, %v568_v34 }
 0x1da   : > { %571 = vst.msk [vmem:[#allocation3] sm:$0x1] %vm570_vm6, %v569_v35 }
 0x1db PF: > { %s1557_s15 = smov 123   ;;  %s1558_s12 = smov 122   ;;  %v586_v59 = vld [vmem:[#allocation2] sm:$0x1]  ;;  %v596_v2 = vld [vmem:[#allocation2 + $0x1] sm:$0x1] }
 0x1dc   : > { %v607_v7 = vld [vmem:[#allocation2 + $0x2] sm:$0x1]  ;;  %v617_v11 = vld [vmem:[#allocation2 + $0x3] sm:$0x1] }
 0x1e1   : > { %v572_v36 = vld [vmem:[#allocation3] sm:$0x1] }
 0x1e2   : > { %574 = vrot.lane.b32.xlu0 %v572_v36, %s1557_s15 }
 0x1e6   : > { %580 = vrot.lane.b32.xlu0 %v572_v36, %s1558_s12 }
 0x254   : > { %v575_v37 = vpop.permute.xlu0 %574 }
 0x255   : > { %1293 = vpush %v575_v37 }
 0x258   : > { %v581_v38 = vpop.permute.xlu0 %580 }
 0x259   : > { %1295 = vpush %v581_v38 }
 0x286   : > { %s1294_s23 = spop %1293 }
 0x287   : > { %v577_v39 = vstv %s1294_s23 }
 0x288   : > { %v579_v40 = vsub.f32 %v449_v13, %v577_v39 }
 0x28a   : > { %v587_v41 = vrot.slane %v579_v40, 4  ;;  %v597_v42 = vmul.f32 %v579_v40, %v579_v40  ;;  %s1296_s17 = spop %1295 }
 0x28b   : > { %v583_v43 = vstv %s1296_s17 }
 0x28c   : > { %v588_v44 = vadd.f32 %v587_v41, %v579_v40  ;;  %v598_v45 = vrot.slane %v597_v42, 4  ;;  %v585_v46 = vsub.f32 %v532_v14, %v583_v43 }
 0x28e   : > { %v589_v47 = vrot.slane %v588_v44, 2  ;;  %v599_v48 = vadd.f32 %v598_v45, %v597_v42  ;;  %v608_v49 = vrot.slane %v585_v46, 4  ;;  %v618_v50 = vmul.f32 %v585_v46, %v585_v46 }
 0x290   : > { %v590_v51 = vadd.f32 %v589_v47, %v588_v44  ;;  %v600_v52 = vrot.slane %v599_v48, 2  ;;  %v609_v53 = vadd.f32 %v608_v49, %v585_v46  ;;  %v619_v54 = vrot.slane %v618_v50, 4 }
 0x292   : > { %v591_v55 = vrot.slane %v590_v51, 1  ;;  %v601_v56 = vadd.f32 %v600_v52, %v599_v48  ;;  %v610_v57 = vrot.slane %v609_v53, 2  ;;  %v620_v58 = vadd.f32 %v619_v54, %v618_v50 }
 0x294   : > { %v592_v60 = vadd.f32 %v591_v55, %v590_v51  ;;  %v602_v61 = vrot.slane %v601_v56, 1  ;;  %v611_v62 = vadd.f32 %v610_v57, %v609_v53  ;;  %v621_v63 = vrot.slane %v620_v58, 2 }
 0x296   : > { %v593_v3 = vadd.f32 %v592_v60, %v586_v59  ;;  %v603_v4 = vadd.f32 %v602_v61, %v601_v56  ;;  %v612_v5 = vrot.slane %v611_v62, 1  ;;  %v622_v6 = vadd.f32 %v621_v63, %v620_v58 }
 0x298   : > { %594 = vst [vmem:[#allocation2] sm:$0x1] %v593_v3  ;;  %v604_v8 = vadd.f32 %v603_v4, %v596_v2  ;;  %v613_v9 = vadd.f32 %v612_v5, %v611_v62  ;;  %v623_v10 = vrot.slane %v622_v6, 1 }
 0x29a   : > { %605 = vst [vmem:[#allocation2 + $0x1] sm:$0x1] %v604_v8  ;;  %v614_v12 = vadd.f32 %v613_v9, %v607_v7  ;;  %v624_v13 = vadd.f32 %v623_v10, %v622_v6 }
 0x29c   : > { %615 = vst [vmem:[#allocation2 + $0x2] sm:$0x1] %v614_v12  ;;  %v625_v14 = vadd.f32 %v624_v13, %v617_v11 }
 0x29e   : > { %626 = vst [vmem:[#allocation2 + $0x3] sm:$0x1] %v625_v14 }
 0x29f PF: > { %p1246_p8 = scmp.ne.s32.totalorder %s1530_s28, 1 }
 0x2a0   : > { %p1247_p9 = scmp.ne.s32.totalorder (!%p1246_p8), %s1526_s27, 0 }
 0x2a1   : > { %630 = sbr.rel (%p1246_p8) target bundleno = 1739 (0x6cb), region = 60 }
 0x2a8   : > { %634 = sbr.rel (%p1247_p9) target bundleno = 1150 (0x47e), region = 64  ;;  %vm636_vm7 = vcmask (!%p1247_p9), 1040384   ;;  %v662_v15 = vld [vmem:[#allocation2 + $0x2] sm:$0x1] (!%p1247_p9)  ;;  %v635_v16 = vld [vmem:[#allocation2] sm:$0x1] (!%p1247_p9)  ;;  %v704_v53 = vlaneseq (!%p1247_p9) }
 0x2a9   : > { %v663_v17 = vsel (!%p1247_p9), %vm636_vm7, %v662_v15, 0.0  ;;  %v637_v18 = vsel (!%p1247_p9), %vm636_vm7, %v635_v16, 0.0  ;;  %v675_v19 = vld [vmem:[#allocation2 + $0x3] sm:$0x1] (!%p1247_p9)  ;;  %v649_v20 = vld [vmem:[#allocation2 + $0x1] sm:$0x1] (!%p1247_p9) }
 0x2aa   : > { %664 = vadd.xlane.f32.xlu1 (!%p1247_p9), %v663_v17  ;;  %638 = vadd.xlane.f32.xlu0 (!%p1247_p9), %v637_v18  ;;  %v676_v21 = vsel (!%p1247_p9), %vm636_vm7, %v675_v19, 0.0  ;;  %v650_v22 = vsel (!%p1247_p9), %vm636_vm7, %v649_v20, 0.0  ;;  %v1559_v23 = vmov (!%p1247_p9), 4   ;;  %v1560_v24 = vmov (!%p1247_p9), 1   ;;  %v695_v61 = vld [vmem:[#allocation3] sm:$0x1] (!%p1247_p9) }
 0x2ab   : > { %1424 = vset.pattern.permute.xlu0 (!%p1247_p9), %v1559_v23  ;;  %1423 = vset.pattern.permute.xlu1 (!%p1247_p9), %v1560_v24  ;;  %v705_v55 = vshrl.u32 (!%p1247_p9), %v704_v53, 7  ;;  %s1561_s6 = smov (!%p1247_p9), 125   ;;  %s1562_s8 = smov (!%p1247_p9), 127   ;;  %vm760_vm8 = vcmask (!%p1247_p9), 31744   ;;  %vm752_vm9 = vcmask (!%p1247_p9), 48128   ;;  %vm762_vm10 = vcmask (!%p1247_p9), 7168  }
 0x2ac   : > { %s1563_s13 = smov (!%p1247_p9), 123   ;;  %s1564_s14 = smov (!%p1247_p9), 126  }
 0x2ad   : > { %v706_v62 = vsub.s32 (!%p1247_p9), 0, %v705_v55 }
 0x2ae   : > { %677 = vadd.xlane.f32.xlu1 (!%p1247_p9), %v676_v21  ;;  %651 = vadd.xlane.f32.xlu0 (!%p1247_p9), %v650_v22  ;;  %v754_v21 = vld [vmem:[%s1848_s3] sm:$0xff] (!%p1247_p9) }
 0x337   : > { %v665_v25 = vpop.xlane.xlu1 %664  ;;  %v639_v26 = vpop.xlane.xlu0 %638 }
 0x338   : > { %v666_v27 = vrot.slane %v665_v25, 4  ;;  %v640_v28 = vrot.slane %v639_v26, 4 }
 0x33a   : > { %v667_v29 = vadd.f32 %v666_v27, %v665_v25  ;;  %v641_v30 = vadd.f32 %v640_v28, %v639_v26  ;;  %v746_v25 = vld [vmem:[%s1847_s2] sm:$0xff] }
 0x33b   : > { %v678_v31 = vpop.xlane.xlu1 %677  ;;  %v652_v32 = vpop.xlane.xlu0 %651 }
 0x33c   : > { %v668_v33 = vrot.slane %v667_v29, 2  ;;  %v642_v34 = vrot.slane %v641_v30, 2  ;;  %v679_v35 = vrot.slane %v678_v31, 4  ;;  %v653_v36 = vrot.slane %v652_v32, 4 }
 0x33e   : > { %v680_v37 = vadd.f32 %v679_v35, %v678_v31  ;;  %v654_v38 = vadd.f32 %v653_v36, %v652_v32  ;;  %v643_v39 = vadd.f32 %v642_v34, %v641_v30  ;;  %v669_v40 = vadd.f32 %v668_v33, %v667_v29 }
 0x340   : > { %v681_v41 = vrot.slane %v680_v37, 2  ;;  %v655_v42 = vrot.slane %v654_v38, 2  ;;  %v644_v43 = vrot.slane %v643_v39, 1  ;;  %v670_v47 = vrot.slane %v669_v40, 1 }
 0x342   : > { %v645_v44 = vadd.f32 %v644_v43, %v643_v39  ;;  %v656_v45 = vadd.f32 %v655_v42, %v654_v38  ;;  %v682_v46 = vadd.f32 %v681_v41, %v680_v37  ;;  %v671_v52 = vadd.f32 %v670_v47, %v669_v40 }
 0x344   : > { %1297 = vpush %v645_v44  ;;  %v657_v48 = vrot.slane %v656_v45, 1  ;;  %v683_v49 = vrot.slane %v682_v46, 1 }
 0x346   : > { %v658_v50 = vadd.f32 %v657_v48, %v656_v45  ;;  %v684_v51 = vadd.f32 %v683_v49, %v682_v46 }
 0x348   : > { %1299 = vpush %v658_v50 }
 0x349   : > { %1301 = vpush %v671_v52 }
 0x34a   : > { %1303 = vpush %v684_v51 }
 0x375   : > { %s1298_s19 = spop %1297 }
 0x376   : > { %v647_v54 = vstv %s1298_s19 }
 0x377   : > { %v687_v58 = vmul.f32 0.00048828125, %v647_v54 }
 0x379   : > { %s1300_s20 = spop %1299  ;;  %v690_v5 = vmul.f32 %v687_v58, %v687_v58  ;;  %v696_v12 = vadd.f32 %v695_v61, %v687_v58 }
 0x37a   : > { %s1302_s5 = spop %1301  ;;  %v660_v56 = vstv %s1300_s20 }
 0x37b   : > { %v673_v57 = vstv %s1302_s5  ;;  %s1304_s9 = spop %1303  ;;  %v689_v63 = vmul.f32 0.00048828125, %v660_v56  ;;  %v707_v14 = vrot.slane %v696_v12, %v706_v62 }
 0x37c   : > { %v688_v59 = vmul.f32 0.00048828125, %v673_v57  ;;  %v686_v60 = vstv %s1304_s9 }
 0x37d   : > { %v692_v4 = vmul.f32 0.00048828125, %v686_v60  ;;  %v691_v8 = vsub.f32 %v689_v63, %v690_v5 }
 0x37e   : > { %v693_v2 = vmul.f32 %v688_v59, %v688_v59  ;;  %v697_v3 = vadd.f32 %v695_v61, %v688_v59 }
 0x37f   : > { %v698_v10 = vadd.f32 1e-05, %v691_v8 }
 0x380   : > { %v694_v6 = vsub.f32 %v692_v4, %v693_v2  ;;  %v726_v7 = vrot.slane %v697_v3, %v706_v62 }
 0x382   : > { %v701_v9 = vadd.f32 1e-05, %v694_v6  ;;  %728 = vrot.lane.b32.xlu0 %v726_v7, %s1561_s6 }
 0x384   : > { %1425 = vrsqrt.f32 %v701_v9 }
 0x385   : > { %1427 = vrsqrt.f32 %v698_v10 }
 0x38e   : > { %v1426_v11 = vpop.eup %1425 }
 0x38f   : > { %v703_v13 = vmul.f32 %v1426_v11, %v1708_v0  ;;  %v1428_v15 = vpop.eup %1427 }
 0x390   : > { %v700_v16 = vmul.f32 %v1428_v15, %v1708_v0 }
 0x391   : > { %756 = vperm.xlu0 %1424, %v703_v13   ;;  %733 = vrot.lane.b32.xlu1 %v703_v13, %s1562_s8 }
 0x395   : > { %709 = vrot.lane.b32.xlu1 %v707_v14, %s1563_s13 }
 0x399   : > { %748 = vperm.xlu1 %1423, %v700_v16  }
 0x39d   : > { %714 = vrot.lane.b32.xlu1 %v700_v16, %s1562_s8 }
 0x3a1   : > { %719 = vrot.lane.b32.xlu1 %v1708_v0, %s1564_s14 }
 0x3a5   : > { %742 = vrot.lane.b32.xlu1 %v1708_v0, %s1563_s13 }
 0x3f4   : > { %v729_v17 = vpop.permute.xlu0 %728 }
 0x3f5   : > { %v731_v18 = vsub.f32 %v1708_v0, %v729_v17 }
 0x403   : > { %v734_v19 = vpop.permute.xlu1 %733 }
 0x404   : > { %v736_v20 = vmul.f32 %v734_v19, %v731_v18 }
 0x406   : > { %738 = vrot.lane.b32.xlu0 %v736_v20, %s1561_s6 }
 0x407   : > { %v710_v24 = vpop.permute.xlu1 %709 }
 0x408   : > { %v712_v29 = vsub.f32 %v1708_v0, %v710_v24 }
 0x410   : > { %v757_v22 = vpop.permute.xlu0 %756 }
 0x411   : > { %v759_v23 = vmul.f32 %v757_v22, %v754_v21 }
 0x413   : > { %761 = vst.msk [vmem:[#allocation6] sm:$0xff] %vm760_vm8, %v759_v23 }
 0x418   : > { %v749_v26 = vpop.permute.xlu1 %748 }
 0x419   : > { %v751_v27 = vmul.f32 %v749_v26, %v746_v25 }
 0x41b   : > { %753 = vst.msk [vmem:[#allocation5] sm:$0xff] %vm752_vm9, %v751_v27 }
 0x41c   : > { %v715_v28 = vpop.permute.xlu1 %714 }
 0x41d   : > { %v717_v31 = vmul.f32 %v715_v28, %v712_v29 }
 0x420   : > { %v720_v30 = vpop.permute.xlu1 %719 }
 0x421   : > { %v722_v32 = vadd.f32 %v720_v30, %v717_v31 }
 0x424   : > { %v743_v34 = vpop.permute.xlu1 %742 }
 0x478   : > { %v739_v33 = vpop.permute.xlu0 %738 }
 0x479   : > { %v741_v35 = vadd.f32 %v739_v33, %v722_v32 }
 0x47b   : > { %v745_v36 = vadd.f32 %v743_v34, %v741_v35 }
 0x47d   : > { %763 = vst.msk [vmem:[#allocation3] sm:$0xff] %vm762_vm10, %v745_v36 }
 0x47e PF: > { %v765_v37 = vld [vmem:[%s1734_s30] sm:$0xf]  ;;  %vm772_vm11 = vcmask 1043456   ;;  %vm850_vm12 = vcmask 1045504   ;;  %v1565_v38 = vmov 0.0   ;;  %v767_v0 = vld [vmem:[#allocation6] sm:$0xff]  ;;  %v950_v52 = vlaneseq }
 0x47f   : > { %1279 = vmatprep.subr.mxu0 %v1565_v38  ;;  %1284 = vmatprep.subr.mxu1 %v1565_v38  ;;  %v764_v39 = vld [vmem:[%s1729_s16] sm:$0x3f]  ;;  %vm768_vm13 = vcmask 31744   ;;  %v766_v40 = vld [vmem:[#allocation5] sm:$0xff]  ;;  %vm846_vm14 = vcmask 48128   ;;  %vm1566_vm15 = vmmov 0  }
 0x480   : > { %1280 = vmatpush3.msk.msra.mxu0 %vm772_vm11, %v765_v37  ;;  %1281 = vmatprep.mubr.msk.f32.mxu0 %vm1566_vm15, %v1565_v38  ;;  %v1567_v42 = vmov 0   ;;  %v932_v43 = vld [vmem:[%s1849_s4] sm:$0xff]  ;;  %v951_v56 = vshrl.u32 %v950_v52, 7  ;;  %vm958_vm0 = vcmask (!%p1247_p9), 1040384   ;;  %vm972_vm1 = vcmask (!%p1247_p9), 57400  }
 0x481   : > { %1285 = vmatpush3.msk.msra.mxu1 %vm850_vm12, %v764_v39  ;;  %1286 = vmatprep.mubr.msk.f32.mxu1 %vm1566_vm15, %v1565_v38 }
 0x482   : > { %1282 = vmatmul.mubr.msk.f32.vlgmr.msra.gmra.mrb[0].mxu0 %vm768_vm13, %v767_v0  ;;  %1287 = vmatmul.mubr.msk.f32.vlgmr.msra.gmra.mrb[0].mxu1 %vm846_vm14, %v766_v40  ;;  %v952_v59 = vsub.s32 0, %v951_v56 }
 0x483   : > { %1429 = vset.pattern.permute.xlu0 %v1567_v42  ;;  %1430 = vset.pattern.permute.xlu1 %v1567_v42 }
 0x484   : > { %v924_v41 = vld [vmem:[#allocation3] sm:$0xff]  ;;  %947 = vperm.xlu1 %1430, %v1713_v1  }
 0x485   : > { %927 = vperm.xlu0 %1429, %v924_v41  }
 0x489   : > { %935 = vperm.xlu0 %1429, %v932_v43  }
 0x503   : > { %v948_v60 = vpop.permute.xlu1 %947 }
 0x504   : > { %v928_v44 = vpop.permute.xlu0 %927  ;;  %v953_v63 = vrot.slane %v948_v60, %v952_v59 }
 0x508   : > { %v936_v53 = vpop.permute.xlu0 %935 }
 0x555   : > { %v842_v45 = vpop.f32.mrb[0].mxu0  ;;  %v920_v46 = vpop.f32.mrb[0].mxu1 }
 0x556   : > { %v921_v47 = vadd.f32 %v920_v46, %v842_v45  ;;  %v1283_v48 = vpop.f32.mrb[1].mxu0  ;;  %v1288_v49 = vpop.f32.mrb[1].mxu1 }
 0x558   : > { %v930_v50 = vadd.f32 %v928_v44, %v921_v47 }
 0x55a   : > { %v931_v51 = vmax.f32 %v930_v50, 0.0 }
 0x55c   : > { %v938_v54 = vmul.f32 %v936_v53, %v931_v51 }
 0x55e   : > { %v939_v55 = vrot.slane %v938_v54, 4 }
 0x560   : > { %v940_v57 = vadd.f32 %v939_v55, %v938_v54 }
 0x562   : > { %v941_v58 = vrot.slane %v940_v57, 2 }
 0x564   : > { %v942_v61 = vadd.f32 %v941_v58, %v940_v57  ;;  %957 = sbr.rel (%p1247_p9) target bundleno = 1597 (0x63d), region = 68 }
 0x566   : > { %v943_v62 = vrot.slane %v942_v61, 1 }
 0x568   : > { %v944_v2 = vadd.f32 %v943_v62, %v942_v61 }
 0x56a   : > { %v954_v3 = vadd.f32 %v953_v63, %v944_v2 }
 0x56c   : > { %v959_v4 = vsel %vm958_vm0, %v954_v3, 0.0 }
 0x56d   : > { %960 = vadd.xlane.f32.xlu0 %v959_v4 }
 0x5fa   : > { %v961_v5 = vpop.xlane.xlu0 %960 }
 0x5fb   : > { %v962_v6 = vrot.slane %v961_v5, 4 }
 0x5fd   : > { %v963_v7 = vadd.f32 %v962_v6, %v961_v5 }
 0x5ff   : > { %v964_v8 = vrot.slane %v963_v7, 2 }
 0x601   : > { %v965_v9 = vadd.f32 %v964_v8, %v963_v7 }
 0x603   : > { %v966_v10 = vrot.slane %v965_v9, 1 }
 0x605   : > { %v967_v11 = vadd.f32 %v966_v10, %v965_v9 }
 0x607   : > { %1305 = vpush %v967_v11 }
 0x638   : > { %s1306_s20 = spop %1305 }
 0x639   : > { %v969_v12 = vstv %s1306_s20 }
 0x63a   : > { %v971_v13 = vmul.f32 0.0078125, %v969_v12 }
 0x63c   : > { %973 = vst.msk [vmem:[#allocation3] sm:$0x1] %vm972_vm1, %v971_v13 }
 0x63d PF: > { %v1568_v15 = vmov 7   ;;  %s990_s5 = scalar_lea.vmem [#allocation4], %s1526_s27  ;;  %v982_v16 = vld [vmem:[#allocation2 + $0x4] sm:$0x1]  ;;  %v986_v19 = vld [vmem:[#allocation2 + $0x5] sm:$0x1] }
 0x63e   : > { %1431 = vset.pattern.permute.xlu0 %v1568_v15  ;;  %991 = vst [vmem:[%s990_s5] sm:$0x1] %v954_v3 }
 0x643   : > { %v974_v14 = vld [vmem:[#allocation3] sm:$0x1] }
 0x644   : > { %977 = vperm.xlu0 %1431, %v974_v14  }
 0x6c3   : > { %v978_v17 = vpop.permute.xlu0 %977 }
 0x6c4   : > { %v980_v18 = vsub.f32 %v954_v3, %v978_v17 }
 0x6c6   : > { %v983_v20 = vadd.f32 %v982_v16, %v980_v18  ;;  %v987_v21 = vmul.f32 %v980_v18, %v980_v18 }
 0x6c8   : > { %984 = vst [vmem:[#allocation2 + $0x4] sm:$0x1] %v983_v20  ;;  %v988_v22 = vadd.f32 %v987_v21, %v986_v19 }
 0x6ca   : > { %989 = vst [vmem:[#allocation2 + $0x5] sm:$0x1] %v988_v22 }
 0x6cb PF: > { %p1253_p11 = scmp.ne.s32.totalorder %s1530_s28, 2 }
 0x6cc   : > { %p1254_p12 = scmp.ne.s32.totalorder (!%p1253_p11), %s1526_s27, 0 }
 0x6cd   : > { %995 = sbr.rel (%p1253_p11) target bundleno = 2509 (0x9cd), region = 72 }
 0x6d4   : > { %999 = sbr.rel (%p1254_p12) target bundleno = 2336 (0x920), region = 76  ;;  %v1001_v23 = vld [vmem:[#allocation2 + $0x4] sm:$0x1] (!%p1254_p12)  ;;  %vm1002_vm2 = vcmask (!%p1254_p12), 1040384   ;;  %v1015_v24 = vld [vmem:[#allocation2 + $0x5] sm:$0x1] (!%p1254_p12)  ;;  %v1037_v47 = vlaneseq (!%p1254_p12) }
 0x6d5   : > { %v1003_v25 = vsel (!%p1254_p12), %vm1002_vm2, %v1001_v23, 0.0  ;;  %v1016_v26 = vsel (!%p1254_p12), %vm1002_vm2, %v1015_v24, 0.0  ;;  %s1569_s8 = smov (!%p1254_p12), 2   ;;  %s1570_s13 = smov (!%p1254_p12), 6   ;;  %v1571_v53 = vmov (!%p1254_p12), 1966171168  }
 0x6d6   : > { %1004 = vadd.xlane.f32.xlu0 (!%p1254_p12), %v1003_v25  ;;  %v1038_v48 = vshrl.u32 (!%p1254_p12), %v1037_v47, 7  ;;  %v1052_v54 = vunpack.c.l.s4 (!%p1254_p12), %v1571_v53  ;;  %v1031_v56 = vld [vmem:[#allocation3] sm:$0x1] (!%p1254_p12)  ;;  %vm1044_vm3 = vcmask (!%p1254_p12), 24600   ;;  %s1572_s14 = smov (!%p1254_p12), 123   ;;  %vm1077_vm4 = vcmask (!%p1254_p12), 32800  }
 0x6d8   : > { %v1039_v49 = vsub.s32 (!%p1254_p12), 0, %v1038_v48  ;;  %v1053_v55 = vunpack.c.0.s8 (!%p1254_p12), %v1052_v54 }
 0x6da   : > { %1017 = vadd.xlane.f32.xlu0 (!%p1254_p12), %v1016_v26  ;;  %v1056_v58 = vsub.s32 (!%p1254_p12), %v1053_v55, %v1038_v48 }
 0x763   : > { %v1005_v27 = vpop.xlane.xlu0 %1004 }
 0x764   : > { %v1006_v28 = vrot.slane %v1005_v27, 4 }
 0x766   : > { %v1007_v29 = vadd.f32 %v1006_v28, %v1005_v27 }
 0x767   : > { %v1018_v30 = vpop.xlane.xlu0 %1017 }
 0x768   : > { %v1008_v31 = vrot.slane %v1007_v29, 2  ;;  %v1019_v32 = vrot.slane %v1018_v30, 4 }
 0x76a   : > { %v1020_v33 = vadd.f32 %v1019_v32, %v1018_v30  ;;  %v1009_v34 = vadd.f32 %v1008_v31, %v1007_v29 }
 0x76c   : > { %v1021_v35 = vrot.slane %v1020_v33, 2  ;;  %v1010_v36 = vrot.slane %v1009_v34, 1 }
 0x76e   : > { %v1011_v37 = vadd.f32 %v1010_v36, %v1009_v34  ;;  %v1022_v38 = vadd.f32 %v1021_v35, %v1020_v33 }
 0x770   : > { %1307 = vpush %v1011_v37  ;;  %v1023_v39 = vrot.slane %v1022_v38, 1 }
 0x772   : > { %v1024_v0 = vadd.f32 %v1023_v39, %v1022_v38 }
 0x774   : > { %1309 = vpush %v1024_v0 }
 0x7a1   : > { %s1308_s9 = spop %1307 }
 0x7a2   : > { %v1013_v40 = vstv %s1308_s9 }
 0x7a3   : > { %v1027_v41 = vmul.f32 0.00390625, %v1013_v40 }
 0x7a5   : > { %s1310_s6 = spop %1309  ;;  %v1029_v43 = vmul.f32 %v1027_v41, %v1027_v41  ;;  %v1032_v57 = vadd.f32 %v1031_v56, %v1027_v41 }
 0x7a6   : > { %v1026_v42 = vstv %s1310_s6 }
 0x7a7   : > { %v1028_v44 = vmul.f32 0.00390625, %v1026_v42 }
 0x7a9   : > { %v1030_v45 = vsub.f32 %v1028_v44, %v1029_v43 }
 0x7ab   : > { %v1033_v46 = vadd.f32 1e-05, %v1030_v45 }
 0x7ad   : > { %1432 = vrsqrt.f32 %v1033_v46 }
 0x7b7   : > { %v1433_v50 = vpop.eup %1432 }
 0x7b8   : > { %v1035_v51 = vmul.f32 %v1433_v50, %v1713_v1 }
 0x7ba   : > { %v1040_v52 = vrot.slane %v1035_v51, %v1039_v49 }
 0x7bc   : > { %1041 = vrot.lane.b32.xlu0 %v1040_v52, %s1569_s8  ;;  %1046 = vrot.lane.b32.xlu1 %v1040_v52, %s1570_s13 }
 0x82e   : > { %v1042_v59 = vpop.permute.xlu0 %1041  ;;  %v1047_v60 = vpop.permute.xlu1 %1046 }
 0x82f   : > { %1045 = vst.msk [vmem:[#allocation3] sm:$0x1] %vm1044_vm3, %v1042_v59  ;;  %v1049_v61 = vmul.f32 %v1047_v60, %v1032_v57 }
 0x831   : > { %v1057_v62 = vrot.slane %v1049_v61, %v1056_v58 }
 0x833   : > { %v1064_v63 = vrot.slane %v1057_v62, %v1056_v58 }
 0x835   : > { %1065 = vrot.lane.b32.xlu1 %v1064_v63, %s1572_s14 }
 0x8a7   : > { %v1066_v2 = vpop.permute.xlu1 %1065 }
 0x8a8   : > { %v1068_v3 = vsub.f32 %v1713_v1, %v1066_v2 }
 0x8aa   : > { %v1073_v4 = vrot.slane %v1068_v3, %v1039_v49 }
 0x8ac   : > { %1074 = vrot.lane.b32.xlu1 %v1073_v4, %s1569_s8 }
 0x91e   : > { %v1075_v5 = vpop.permute.xlu1 %1074 }
 0x91f   : > { %1078 = vst.msk [vmem:[#allocation3] sm:$0x1] %vm1077_vm4, %v1075_v5 }
 0x920 PF: > { %v1573_v7 = vmov 3   ;;  %v1574_v8 = vmov 4   ;;  %s1079_s15 = scalar_lea.vmem [#allocation4], %s1526_s27  ;;  %v1101_v16 = vlaneseq  ;;  %v1099_v20 = vld [vmem:[%s1734_s30] sm:$0xf] }
 0x921   : > { %1434 = vset.pattern.permute.xlu0 %v1573_v7  ;;  %v1080_v10 = vld [vmem:[%s1079_s15] sm:$0x1] }
 0x922   : > { %v1102_v17 = vshrl.u32 %v1101_v16, 7 }
 0x924   : > { %v1103_v18 = vsub.s32 0, %v1102_v17 }
 0x926   : > { %v1081_v6 = vld [vmem:[#allocation3] sm:$0x1] }
 0x927   : > { %1084 = vperm.xlu0 %1434, %v1081_v6  }
 0x92b   : > { %1435 = vset.pattern.permute.xlu0 %v1574_v8 }
 0x92c   : > { %1089 = vperm.xlu0 %1435, %v1081_v6  }
 0x9a6   : > { %v1085_v9 = vpop.permute.xlu0 %1084 }
 0x9a7   : > { %v1087_v1 = vmul.f32 %v1085_v9, %v1080_v10 }
 0x9ab   : > { %v1090_v11 = vpop.permute.xlu0 %1089 }
 0x9ac   : > { %v1092_v12 = vadd.f32 %v1090_v11, %v1087_v1 }
 0x9ae   : > { %v1255_v13 = vmul.f32 -1.442695, %v1092_v12 }
 0x9b0   : > { %1436 = vpow2.f32 %v1255_v13 }
 0x9ba   : > { %v1437_v14 = vpop.eup %1436 }
 0x9bb   : > { %v1096_v15 = vadd.f32 1.0, %v1437_v14 }
 0x9bd   : > { %1438 = vrcp.f32 %v1096_v15 }
 0x9c7   : > { %v1439_v19 = vpop.eup %1438 }
 0x9c8   : > { %v1104_v21 = vrot.slane %v1439_v19, %v1103_v18 }
 0x9ca   : > { %v1106_v22 = vmul.f32 %v1104_v21, %v1099_v20 }
 0x9cc   : > { %1107 = vst [vmem:[%s337_s11] sm:$0xf] %v1106_v22 }
 0x9cd PF: > { %s1257_s12 = sshll.u32 %s1534_s29, 1  ;;  %s1898_s27 = smov (!%p338_p1, %s1526_s27), 0 }
 0x9ce   : > { %s1126_s23 = sshll.u32 %s337_s11, 4  ;;  %s1122_s17 = sadd.s32 %s1257_s12, %s1898_s27  ;;  %s1788_s23 = int_to_ptr.vmem [resolvable:$true] %s1126_s23 }
 0x9cf   : > { %s1258_s30 = sshll.u32 %s1122_s17, 6  ;;  %s1873_s5 = sand.u32 1, %s1518_s25  }
 0x9d0   : > { %s1124_s20 = scalar_lea.hbm %s1852_s7, %s1258_s30  ;;  %s1109_s9 = scalar_lea.sflag [#allocation8], %s1873_s5 }
 0x9d1   : > { %s1440_s6 = scalar_lea.vmem %s1788_s23, 64  ;;  %s1575_s28 = smov [#allocation7]  }
 0x9d2   : > { %p1441_p13 = scmp.ne.s32.totalorder %s1788_s23, %s1440_s6  ;;  %s1444_s29 = sshll.u32 %s1575_s28, 4  ;;  %s1445_s29 = int_to_ptr.vmem [resolvable:$false] %s1444_s29 }
 0x9d3   : > { %s1446_s27 = scalar_lea.vmem %s1445_s29, 128  ;;  %p1447_p2 = scmp.lt.s32.totalorder %s1788_s23, %s1445_s29 }
 0x9d4   : > { %p1442_p0 = pnand %p1441_p13, %p1685_p7  ;;  %p1448_p3 = scmp.lt.s32.totalorder %s1446_s27, %s1440_s6 }
 0x9d6   : > { %p1443_p1 = pneg %p1442_p0  ;;  %p1449_p4 = por %p1448_p3, %p1447_p2 }
 0x9d8   : > { %p1450_p5 = pnand %p1449_p4, %p1443_p1 }
 0x9da   : > { %1453 = shalt.err (!%p1450_p5)
}
 0x9db   : > { %s1454_s11 = scalar_lea.hbm %s1124_s20, 64  ;;  %s1458_s13 = scalar_lea.hbm %s1852_s7, 256 }
 0x9dc   : > { %p1455_p6 = scmp.ne.s32.totalorder %s1124_s20, %s1454_s11  ;;  %p1459_p11 = scmp.lt.u32.totalorder %s1124_s20, %s1852_s7 }
 0x9dd   : > { %p1460_p12 = scmp.lt.u32.totalorder %s1458_s13, %s1454_s11  ;;  %p1462_p0 = scmp.lt.u32.totalorder %s1454_s11, %s1124_s20 }
 0x9de   : > { %p1456_p8 = pnand %p1455_p6, %p1685_p7 }
 0x9df   : > { %p1461_p13 = por %p1460_p12, %p1459_p11 }
 0x9e0   : > { %p1457_p9 = pneg %p1456_p8 }
 0x9e1   : > { %p1463_p2 = por %p1462_p0, %p1461_p13 }
 0x9e3   : > { %p1464_p1 = pnand %p1463_p2, %p1457_p9 }
 0x9e5   : > { %1467 = shalt.err (!%p1464_p1)
}
 0x9e6   : > { %1311 = dma.vmem_to_hbm [thread:$0]  (%p1685_p7), %s1788_s23, 64, %s1124_s20, %s1109_s9  }
 0x9e7 PF: > { %p1317_p3 = scmp.ge.s32.totalorder %s1550_s10, 2  ;;  %s1138_s12 = sand.u32 1, %s1514_s24  }
 0x9e8   : > { %s1139_s17 = scalar_lea.sflag [#allocation8], %s1138_s12 }
 0x9e9   : > { %p1314_p4 = pnand %p1317_p3, %p1692_p10 }
 0x9eb   : > { %1509 = dma.done.wait (!%p1314_p4), %s1139_s17, 64  }
 0x9ec   : > { %1511 = vsyncadd (!%p1314_p4), %s1139_s17, 4294967232  ;;  %s20_s10 = sadd.s32 1, %s1550_s10   ;;  %s1874_s30 = sld [smem:[#allocation16_spill]] }
 0x9ed   : > { %p17_p5 = scmp.ge.s32.totalorder %s20_s10, 14   ;;  %s1875_s27 = sld [smem:[#allocation10_spill]] }
 0x9ee   : > { %s1876_s28 = sld [smem:[#allocation11_spill]]  ;;  %s1877_s29 = sld [smem:[#allocation12_spill]] }
 0x9ef   : > { %s1878_s18 = sld [smem:[#allocation13_spill]]  ;;  %s1879_s8 = sld [smem:[#allocation14_spill]] }
 0x9f0   : > { %s1880_s9 = sld [smem:[#allocation15_spill]]  ;;  %s1881_s24 = smov %s1518_s25 }
 0x9f1   : > { %s1882_s25 = smov %s1522_s26  ;;  %19 = sbr.rel (!%p17_p5) target bundleno = 9 (0x9), region = 126 }
 0x9f2   : > { %s1883_s26 = smov %s1874_s30 }
 0x9f5   : > { %s1884_s30 = smov %s1878_s18 }
 0x9f8   :  { %1144 = vsyncpa [#allocation8], 1 }
 0x9f9   :  { %1146 = vsyncpa [#allocation8 + $0x1], 1 }

</bundles_post_ra>
